<compile_context>
chip_gen: v5e
topology: v5e:2x2
jax: 0.10.0
libtpu: 0.0.40
codegen_flags: <defaults>
</compile_context>

<pallas_src>
import numpy as np
import jax
import jax.numpy as jnp
from jax import lax
from jax.experimental import pallas as pl
from jax.experimental.pallas import tpu as pltpu


_VMEM = pl.BlockSpec(memory_space=pltpu.MemorySpace.VMEM)


# ----------------------------------------------------------------------------
# Fused kernel: BiLSTM recurrence + hidden2tag + log_softmax.
# ----------------------------------------------------------------------------
def make_tagger_kernel(T, Bp, H):
    H2 = 2 * H  # fused hidden width [fwd | bwd]

    def kernel(x2_ref, mask_ref, wih_ref, whh_ref, b_ref, wtag_ref, btag_ref,
               scores_ref, xp_ref, lstmf_ref, lstmb_ref):
        # ---- hoisted input projection: one big matmul for ALL timesteps and
        # both directions (block-diagonal, gate-interleaved weight), bias
        # folded in once here (no per-step broadcast). ----
        xp_ref[...] = (jnp.dot(x2_ref[...], wih_ref[...],
                               preferred_element_type=jnp.float32)
                       + b_ref[...])                       # (T*Bp, 8H)

        whh = whh_ref[...]                                 # (2H, 8H)

        def step(t, carry):
            h2, c2 = carry                                 # (Bp, 2H) each
            row_f = pl.multiple_of(t * Bp, Bp)             # time t (forward)
            row_b = pl.multiple_of((T - 1 - t) * Bp, Bp)   # time T-1-t (bwd)

            # single recurrent matmul feeds both directions
            gates = (xp_ref[pl.ds(row_f, Bp), :]
                     + jnp.dot(h2, whh, preferred_element_type=jnp.float32))
            # gate-interleaved column layout: [i_f,i_b, f_f,f_b, g_f,g_b, o_f,o_b]
            sig = jax.nn.sigmoid(gates)                    # lane-dense (Bp, 8H)
            i_g = sig[:, 0 * H2:1 * H2]
            f_g = sig[:, 1 * H2:2 * H2]
            o_g = sig[:, 3 * H2:4 * H2]
            g_g = jnp.tanh(gates[:, 2 * H2:3 * H2])

            c_new = f_g * c2 + i_g * g_g
            h_new = o_g * jnp.tanh(c_new)

            m = mask_ref[pl.ds(row_f, Bp), :]              # (Bp, 2H) in {0,1}
            h2 = m * h_new + (1.0 - m) * h2                # freeze past length
            c2 = m * c_new + (1.0 - m) * c2
            out = m * h_new                                # zero padded slots

            lstmf_ref[pl.ds(row_f, Bp), :] = out[:, :H]    # fwd hidden @ t
            lstmb_ref[pl.ds(row_b, Bp), :] = out[:, H:]    # bwd hidden @ T-1-t
            return h2, c2

        zero = jnp.zeros((Bp, H2), jnp.float32)
        lax.fori_loop(0, T, step, (zero, zero), unroll=True)

        # ---- fused hidden2tag + log_softmax on the whole slab (still in VMEM)
        logits = (jnp.dot(lstmf_ref[...], wtag_ref[:H, :],
                          preferred_element_type=jnp.float32)
                  + jnp.dot(lstmb_ref[...], wtag_ref[H:, :],
                            preferred_element_type=jnp.float32)
                  + btag_ref[...])                         # (T*Bp, K)
        mx = jnp.max(logits, axis=-1, keepdims=True)
        s = logits - mx
        lse = jnp.log(jnp.sum(jnp.exp(s), axis=-1, keepdims=True))
        # K < 128 lanes -> masked partial stores; fine at these sizes (could be
        # padded to 128 lanes for production tag-set sizes).
        scores_ref[...] = s - lse

    return kernel


# ----------------------------------------------------------------------------
# Parameter fusion helpers (one-time prep, wrapper side).
# ----------------------------------------------------------------------------
def _fuse_dir_weights(wf, wb, H):
    """Block-diagonal fwd/bwd fusion with per-gate column interleave.

    wf: (Df, 4H), wb: (Db, 4H) -> (Df+Db, 8H) with column blocks ordered
    [i_f, i_b, f_f, f_b, g_f, g_b, o_f, o_b] (PyTorch gate order i,f,g,o).
    """
    Df, Db = wf.shape[0], wb.shape[0]
    cols = []
    for g in range(4):
        cols.append(jnp.concatenate(
            [wf[:, g * H:(g + 1) * H], jnp.zeros((Db, H), wf.dtype)], axis=0))
        cols.append(jnp.concatenate(
            [jnp.zeros((Df, H), wb.dtype), wb[:, g * H:(g + 1) * H]], axis=0))
    return jnp.concatenate(cols, axis=1)


def _fuse_dir_bias(bf, bb, H):
    parts = []
    for g in range(4):
        parts.append(bf[:, g * H:(g + 1) * H])
        parts.append(bb[:, g * H:(g + 1) * H])
    return jnp.concatenate(parts, axis=1)   # (1, 8H)


# ----------------------------------------------------------------------------
# Forward wrapper (embedding lookup + layout prep are XLA glue).
# ----------------------------------------------------------------------------
def lstm_tagger_forward(tokens, lengths, params):
    B, T = tokens.shape
    H = params["whh_f"].shape[0]
    K = params["w_tag"].shape[1]
    Bp = ((B + 7) // 8) * 8                    # pad batch to full sublane tile

    # embedding lookup; dropout p=0 -> identity; extFeats=None -> no branch
    embeds = params["embedding"][tokens].astype(jnp.float32)       # (B, T, E)
    x = jnp.transpose(embeds, (1, 0, 2))                            # (T, B, E)
    x = jnp.pad(x, ((0, 0), (0, Bp - B), (0, 0)))                   # (T, Bp, E)
    # row t carries [x(t) | x(T-1-t)] so one matmul projects both directions
    x2 = jnp.concatenate([x, x[::-1]], axis=-1).reshape(T * Bp, -1)

    lengths_p = jnp.pad(lengths.astype(jnp.int32), (0, Bp - B))
    t_idx = jnp.arange(T, dtype=jnp.int32)[:, None]                 # (T, 1)
    m_f = lengths_p[None, :] > t_idx                                # (T, Bp)
    m_b = lengths_p[None, :] > (T - 1 - t_idx)                      # (T, Bp)
    mask2 = jnp.concatenate(
        [jnp.broadcast_to(m_f[:, :, None], (T, Bp, H)),
         jnp.broadcast_to(m_b[:, :, None], (T, Bp, H))],
        axis=-1).astype(jnp.float32).reshape(T * Bp, 2 * H)

    wih = _fuse_dir_weights(params["wih_f"], params["wih_b"], H)    # (2E, 8H)
    whh = _fuse_dir_weights(params["whh_f"], params["whh_b"], H)    # (2H, 8H)
    bias = _fuse_dir_bias(params["b_f"], params["b_b"], H)          # (1, 8H)

    kernel = make_tagger_kernel(T, Bp, H)
    scores_flat = pl.pallas_call(
        kernel,
        out_shape=jax.ShapeDtypeStruct((T * Bp, K), jnp.float32),
        in_specs=[_VMEM] * 7,
        out_specs=_VMEM,
        scratch_shapes=[
            pltpu.VMEM((T * Bp, 8 * H), jnp.float32),   # hoisted input gates
            pltpu.VMEM((T * Bp, H), jnp.float32),       # forward hiddens
            pltpu.VMEM((T * Bp, H), jnp.float32),       # backward hiddens
        ],
    )(x2, mask2, wih, whh, bias, params["w_tag"], params["b_tag"])

    # time-major (T*Bp, K) -> batch-first (B, T, K); drop batch padding
    return scores_flat.reshape(T, Bp, K).transpose(1, 0, 2)[:B]


# ----------------------------------------------------------------------------
# Pure-JAX reference (same math, host-level python loop) for a sanity check.
# ----------------------------------------------------------------------------
def reference_forward(tokens, lengths, params):
    embeds = params["embedding"][tokens].astype(jnp.float32)
    B, T, _ = embeds.shape
    H = params["whh_f"].shape[0]

    def run_dir(wih, whh, b, reverse):
        h = jnp.zeros((B, H), jnp.float32)
        c = jnp.zeros((B, H), jnp.float32)
        outs = [None] * T
        order = range(T - 1, -1, -1) if reverse else range(T)
        for t in order:
            x_t = embeds[:, t, :]
            gates = x_t @ wih + h @ whh + b
            i = jax.nn.sigmoid(gates[:, :H])
            f = jax.nn.sigmoid(gates[:, H:2 * H])
            g = jnp.tanh(gates[:, 2 * H:3 * H])
            o = jax.nn.sigmoid(gates[:, 3 * H:])
            cn = f * c + i * g
            hn = o * jnp.tanh(cn)
            m = (lengths > t).reshape(-1, 1)
            h = jnp.where(m, hn, h)
            c = jnp.where(m, cn, c)
            outs[t] = jnp.where(m, hn, 0.0)
        return jnp.stack(outs, axis=1)

    of = run_dir(params["wih_f"], params["whh_f"], params["b_f"], False)
    ob = run_dir(params["wih_b"], params["whh_b"], params["b_b"], True)
    lstm_out = jnp.concatenate([of, ob], axis=-1)
    logits = lstm_out.reshape(B * T, -1) @ params["w_tag"] + params["b_tag"]
    return jax.nn.log_softmax(logits, axis=-1).reshape(B, T, -1)


# ----------------------------------------------------------------------------
# Main: deterministic parameters + inputs, run once, verify, print KERNEL_OK.
# ----------------------------------------------------------------------------
if __name__ == "__main__":
    B, T = 2, 8
    EMBED_DIM = 32        # embedding_dim
    HIDDEN_DIM = 32       # hidden_dim
    VOCAB = 50            # vocab_size
    TAGSET = 10           # tagset_size
    H4 = 4 * HIDDEN_DIM

    key = jax.random.PRNGKey(0)
    ks = jax.random.split(key, 12)

    def u(k, shape):
        # matches init_weights(initrange=0.2): uniform(-0.2, 0.2)
        return jax.random.uniform(k, shape, jnp.float32, -0.2, 0.2)

    params = {
        "embedding": u(ks[0], (VOCAB, EMBED_DIM)),
        # forward direction (weights stored pre-transposed: (in, 4H))
        "wih_f": u(ks[1], (EMBED_DIM, H4)),
        "whh_f": u(ks[2], (HIDDEN_DIM, H4)),
        "b_f":   u(ks[3], (1, H4)) + u(ks[4], (1, H4)),   # b_ih + b_hh
        # backward direction
        "wih_b": u(ks[5], (EMBED_DIM, H4)),
        "whh_b": u(ks[6], (HIDDEN_DIM, H4)),
        "b_b":   u(ks[7], (1, H4)) + u(ks[8], (1, H4)),
        # hidden2tag: (2H, K) and bias (1, K)
        "w_tag": u(ks[9], (2 * HIDDEN_DIM, TAGSET)),
        "b_tag": u(ks[10], (1, TAGSET)),
    }

    tokens = jax.random.randint(ks[11], (B, T), 0, VOCAB)
    # pack_padded_sequence default requires descending lengths, max == T
    lengths = jnp.array([8, 5], dtype=jnp.int32)

    tag_scores = lstm_tagger_forward(tokens, lengths, params)
    tag_scores = jax.block_until_ready(tag_scores)

    ref = reference_forward(tokens, lengths, params)
    np.testing.assert_allclose(np.asarray(tag_scores), np.asarray(ref),
                               rtol=1e-3, atol=1e-3)

    # TODO(synk): elmo / pretrained-transformer embedding branches are external
    # submodules and are not translated; only the nn.Embedding path is used.
    print("KERNEL_OK")
</pallas_src>

<mosaic_0001>
module attributes {stable_mosaic.version = 11 : i64} {
  func.func @kernel(%arg0: memref<64x64xf32, #tpu.memory_space<vmem>>, %arg1: memref<64x64xf32, #tpu.memory_space<vmem>>, %arg2: memref<64x256xf32, #tpu.memory_space<vmem>>, %arg3: memref<64x256xf32, #tpu.memory_space<vmem>>, %arg4: memref<1x256xf32, #tpu.memory_space<vmem>>, %arg5: memref<64x10xf32, #tpu.memory_space<vmem>>, %arg6: memref<1x10xf32, #tpu.memory_space<vmem>>, %arg7: memref<64x10xf32, #tpu.memory_space<vmem>>, %arg8: memref<64x256xf32, #tpu.memory_space<vmem>>, %arg9: memref<64x32xf32, #tpu.memory_space<vmem>>, %arg10: memref<64x32xf32, #tpu.memory_space<vmem>>) attributes {dimension_semantics = [], scalar_prefetch = 0 : i64, scratch_operands = 3 : i64, tpu.core_type = #tpu.core_type<tc>} {
    %c0 = arith.constant 0 : index
    %c0_0 = arith.constant 0 : index
    %0 = vector.load %arg0[%c0, %c0_0] : memref<64x64xf32, #tpu.memory_space<vmem>>, vector<64x64xf32>
    %c0_1 = arith.constant 0 : index
    %c0_2 = arith.constant 0 : index
    %1 = vector.load %arg2[%c0_1, %c0_2] : memref<64x256xf32, #tpu.memory_space<vmem>>, vector<64x256xf32>
    %cst = arith.constant dense<0.000000e+00> : vector<64x256xf32>
    %2 = tpu.matmul %0, %1, %cst {dimension_numbers = #tpu.dot_dimension_numbers<[1], [0], [0], [1], [0, 0, 1, 1], [], []>} : vector<64x64xf32>, vector<64x256xf32>, vector<64x256xf32> -> vector<64x256xf32>
    %c0_3 = arith.constant 0 : index
    %c0_4 = arith.constant 0 : index
    %3 = vector.load %arg4[%c0_3, %c0_4] : memref<1x256xf32, #tpu.memory_space<vmem>>, vector<1x256xf32>
    %4 = vector.broadcast %3 : vector<1x256xf32> to vector<64x256xf32>
    %5 = arith.addf %2, %4 : vector<64x256xf32>
    %c0_5 = arith.constant 0 : index
    %c0_6 = arith.constant 0 : index
    %6 = vector.load %arg8[%c0_5, %c0_6] : memref<64x256xf32, #tpu.memory_space<vmem>>, vector<64x256xf32>
    tpu.vector_store %arg8[%c0_5, %c0_6], %5 {strides = array<i32>} : memref<64x256xf32, #tpu.memory_space<vmem>>, vector<64x256xf32>,
    %c0_7 = arith.constant 0 : index
    %c0_8 = arith.constant 0 : index
    %7 = vector.load %arg3[%c0_7, %c0_8] : memref<64x256xf32, #tpu.memory_space<vmem>>, vector<64x256xf32>
    %cst_9 = arith.constant 0.000000e+00 : f32
    %8 = vector.broadcast %cst_9 : f32 to vector<8x64xf32>
    %c0_i32 = arith.constant 0 : i32
    %c8_i32 = arith.constant 8 : i32
    %9 = arith.muli %c0_i32, %c8_i32 : i32
    %10 = tpu.assume_multiple %9, 8 : i32
    %c7_i32 = arith.constant 7 : i32
    %11 = arith.subi %c7_i32, %c0_i32 : i32
    %c8_i32_10 = arith.constant 8 : i32
    %12 = arith.muli %11, %c8_i32_10 : i32
    %13 = tpu.assume_multiple %12, 8 : i32
    %14 = arith.index_cast %10 : i32 to index
    %c0_11 = arith.constant 0 : index
    %15 = vector.load %arg8[%14, %c0_11] : memref<64x256xf32, #tpu.memory_space<vmem>>, vector<8x256xf32>
    %cst_12 = arith.constant dense<0.000000e+00> : vector<8x256xf32>
    %16 = tpu.matmul %8, %7, %cst_12 {dimension_numbers = #tpu.dot_dimension_numbers<[1], [0], [0], [1], [0, 0, 1, 1], [], []>} : vector<8x64xf32>, vector<64x256xf32>, vector<8x256xf32> -> vector<8x256xf32>
    %17 = arith.addf %15, %16 : vector<8x256xf32>
    %18 = arith.negf %17 : vector<8x256xf32>
    %19 = math.exp %18 : vector<8x256xf32>
    %cst_13 = arith.constant 1.000000e+00 : f32
    %20 = vector.broadcast %cst_13 : f32 to vector<8x256xf32>
    %21 = arith.addf %20, %19 : vector<8x256xf32>
    %22 = arith.divf %20, %21 : vector<8x256xf32>
    %23 = vector.extract_strided_slice %22 {offsets = [0, 0], sizes = [8, 64], strides = [1, 1]} : vector<8x256xf32> to vector<8x64xf32>
    %24 = vector.extract_strided_slice %22 {offsets = [0, 64], sizes = [8, 64], strides = [1, 1]} : vector<8x256xf32> to vector<8x64xf32>
    %25 = vector.extract_strided_slice %22 {offsets = [0, 192], sizes = [8, 64], strides = [1, 1]} : vector<8x256xf32> to vector<8x64xf32>
    %26 = vector.extract_strided_slice %17 {offsets = [0, 128], sizes = [8, 64], strides = [1, 1]} : vector<8x256xf32> to vector<8x64xf32>
    %27 = math.tanh %26 : vector<8x64xf32>
    %28 = arith.mulf %24, %8 : vector<8x64xf32>
    %29 = arith.mulf %23, %27 : vector<8x64xf32>
    %30 = arith.addf %28, %29 : vector<8x64xf32>
    %31 = math.tanh %30 : vector<8x64xf32>
    %32 = arith.mulf %25, %31 : vector<8x64xf32>
    %33 = arith.index_cast %10 : i32 to index
    %c0_14 = arith.constant 0 : index
    %34 = vector.load %arg1[%33, %c0_14] : memref<64x64xf32, #tpu.memory_space<vmem>>, vector<8x64xf32>
    %35 = arith.mulf %34, %32 : vector<8x64xf32>
    %cst_15 = arith.constant 1.000000e+00 : f32
    %36 = vector.broadcast %cst_15 : f32 to vector<8x64xf32>
    %37 = arith.subf %36, %34 : vector<8x64xf32>
    %38 = arith.mulf %37, %8 : vector<8x64xf32>
    %39 = arith.addf %35, %38 : vector<8x64xf32>
    %40 = arith.mulf %34, %30 : vector<8x64xf32>
    %cst_16 = arith.constant 1.000000e+00 : f32
    %41 = vector.broadcast %cst_16 : f32 to vector<8x64xf32>
    %42 = arith.subf %41, %34 : vector<8x64xf32>
    %43 = arith.mulf %42, %8 : vector<8x64xf32>
    %44 = arith.addf %40, %43 : vector<8x64xf32>
    %45 = arith.mulf %34, %32 : vector<8x64xf32>
    %46 = vector.extract_strided_slice %45 {offsets = [0, 0], sizes = [8, 32], strides = [1, 1]} : vector<8x64xf32> to vector<8x32xf32>
    %47 = arith.index_cast %10 : i32 to index
    %c0_17 = arith.constant 0 : index
    %48 = vector.load %arg9[%47, %c0_17] : memref<64x32xf32, #tpu.memory_space<vmem>>, vector<8x32xf32>
    tpu.vector_store %arg9[%47, %c0_17], %46 {strides = array<i32>} : memref<64x32xf32, #tpu.memory_space<vmem>>, vector<8x32xf32>,
    %49 = vector.extract_strided_slice %45 {offsets = [0, 32], sizes = [8, 32], strides = [1, 1]} : vector<8x64xf32> to vector<8x32xf32>
    %50 = arith.index_cast %13 : i32 to index
    %c0_18 = arith.constant 0 : index
    %51 = vector.load %arg10[%50, %c0_18] : memref<64x32xf32, #tpu.memory_space<vmem>>, vector<8x32xf32>
    tpu.vector_store %arg10[%50, %c0_18], %49 {strides = array<i32>} : memref<64x32xf32, #tpu.memory_space<vmem>>, vector<8x32xf32>,
    %c1_i32 = arith.constant 1 : i32
    %c8_i32_19 = arith.constant 8 : i32
    %52 = arith.muli %c1_i32, %c8_i32_19 : i32
    %53 = tpu.assume_multiple %52, 8 : i32
    %c7_i32_20 = arith.constant 7 : i32
    %54 = arith.subi %c7_i32_20, %c1_i32 : i32
    %c8_i32_21 = arith.constant 8 : i32
    %55 = arith.muli %54, %c8_i32_21 : i32
    %56 = tpu.assume_multiple %55, 8 : i32
    %57 = arith.index_cast %53 : i32 to index
    %c0_22 = arith.constant 0 : index
    %58 = vector.load %arg8[%57, %c0_22] : memref<64x256xf32, #tpu.memory_space<vmem>>, vector<8x256xf32>
    %cst_23 = arith.constant dense<0.000000e+00> : vector<8x256xf32>
    %59 = tpu.matmul %39, %7, %cst_23 {dimension_numbers = #tpu.dot_dimension_numbers<[1], [0], [0], [1], [0, 0, 1, 1], [], []>} : vector<8x64xf32>, vector<64x256xf32>, vector<8x256xf32> -> vector<8x256xf32>
    %60 = arith.addf %58, %59 : vector<8x256xf32>
    %61 = arith.negf %60 : vector<8x256xf32>
    %62 = math.exp %61 : vector<8x256xf32>
    %cst_24 = arith.constant 1.000000e+00 : f32
    %63 = vector.broadcast %cst_24 : f32 to vector<8x256xf32>
    %64 = arith.addf %63, %62 : vector<8x256xf32>
    %65 = arith.divf %63, %64 : vector<8x256xf32>
    %66 = vector.extract_strided_slice %65 {offsets = [0, 0], sizes = [8, 64], strides = [1, 1]} : vector<8x256xf32> to vector<8x64xf32>
    %67 = vector.extract_strided_slice %65 {offsets = [0, 64], sizes = [8, 64], strides = [1, 1]} : vector<8x256xf32> to vector<8x64xf32>
    %68 = vector.extract_strided_slice %65 {offsets = [0, 192], sizes = [8, 64], strides = [1, 1]} : vector<8x256xf32> to vector<8x64xf32>
    %69 = vector.extract_strided_slice %60 {offsets = [0, 128], sizes = [8, 64], strides = [1, 1]} : vector<8x256xf32> to vector<8x64xf32>
    %70 = math.tanh %69 : vector<8x64xf32>
    %71 = arith.mulf %67, %44 : vector<8x64xf32>
    %72 = arith.mulf %66, %70 : vector<8x64xf32>
    %73 = arith.addf %71, %72 : vector<8x64xf32>
    %74 = math.tanh %73 : vector<8x64xf32>
    %75 = arith.mulf %68, %74 : vector<8x64xf32>
    %76 = arith.index_cast %53 : i32 to index
    %c0_25 = arith.constant 0 : index
    %77 = vector.load %arg1[%76, %c0_25] : memref<64x64xf32, #tpu.memory_space<vmem>>, vector<8x64xf32>
    %78 = arith.mulf %77, %75 : vector<8x64xf32>
    %cst_26 = arith.constant 1.000000e+00 : f32
    %79 = vector.broadcast %cst_26 : f32 to vector<8x64xf32>
    %80 = arith.subf %79, %77 : vector<8x64xf32>
    %81 = arith.mulf %80, %39 : vector<8x64xf32>
    %82 = arith.addf %78, %81 : vector<8x64xf32>
    %83 = arith.mulf %77, %73 : vector<8x64xf32>
    %cst_27 = arith.constant 1.000000e+00 : f32
    %84 = vector.broadcast %cst_27 : f32 to vector<8x64xf32>
    %85 = arith.subf %84, %77 : vector<8x64xf32>
    %86 = arith.mulf %85, %44 : vector<8x64xf32>
    %87 = arith.addf %83, %86 : vector<8x64xf32>
    %88 = arith.mulf %77, %75 : vector<8x64xf32>
    %89 = vector.extract_strided_slice %88 {offsets = [0, 0], sizes = [8, 32], strides = [1, 1]} : vector<8x64xf32> to vector<8x32xf32>
    %90 = arith.index_cast %53 : i32 to index
    %c0_28 = arith.constant 0 : index
    %91 = vector.load %arg9[%90, %c0_28] : memref<64x32xf32, #tpu.memory_space<vmem>>, vector<8x32xf32>
    tpu.vector_store %arg9[%90, %c0_28], %89 {strides = array<i32>} : memref<64x32xf32, #tpu.memory_space<vmem>>, vector<8x32xf32>,
    %92 = vector.extract_strided_slice %88 {offsets = [0, 32], sizes = [8, 32], strides = [1, 1]} : vector<8x64xf32> to vector<8x32xf32>
    %93 = arith.index_cast %56 : i32 to index
    %c0_29 = arith.constant 0 : index
    %94 = vector.load %arg10[%93, %c0_29] : memref<64x32xf32, #tpu.memory_space<vmem>>, vector<8x32xf32>
    tpu.vector_store %arg10[%93, %c0_29], %92 {strides = array<i32>} : memref<64x32xf32, #tpu.memory_space<vmem>>, vector<8x32xf32>,
    %c2_i32 = arith.constant 2 : i32
    %c8_i32_30 = arith.constant 8 : i32
    %95 = arith.muli %c2_i32, %c8_i32_30 : i32
    %96 = tpu.assume_multiple %95, 8 : i32
    %c7_i32_31 = arith.constant 7 : i32
    %97 = arith.subi %c7_i32_31, %c2_i32 : i32
    %c8_i32_32 = arith.constant 8 : i32
    %98 = arith.muli %97, %c8_i32_32 : i32
    %99 = tpu.assume_multiple %98, 8 : i32
    %100 = arith.index_cast %96 : i32 to index
    %c0_33 = arith.constant 0 : index
    %101 = vector.load %arg8[%100, %c0_33] : memref<64x256xf32, #tpu.memory_space<vmem>>, vector<8x256xf32>
    %cst_34 = arith.constant dense<0.000000e+00> : vector<8x256xf32>
    %102 = tpu.matmul %82, %7, %cst_34 {dimension_numbers = #tpu.dot_dimension_numbers<[1], [0], [0], [1], [0, 0, 1, 1], [], []>} : vector<8x64xf32>, vector<64x256xf32>, vector<8x256xf32> -> vector<8x256xf32>
    %103 = arith.addf %101, %102 : vector<8x256xf32>
    %104 = arith.negf %103 : vector<8x256xf32>
    %105 = math.exp %104 : vector<8x256xf32>
    %cst_35 = arith.constant 1.000000e+00 : f32
    %106 = vector.broadcast %cst_35 : f32 to vector<8x256xf32>
    %107 = arith.addf %106, %105 : vector<8x256xf32>
    %108 = arith.divf %106, %107 : vector<8x256xf32>
    %109 = vector.extract_strided_slice %108 {offsets = [0, 0], sizes = [8, 64], strides = [1, 1]} : vector<8x256xf32> to vector<8x64xf32>
    %110 = vector.extract_strided_slice %108 {offsets = [0, 64], sizes = [8, 64], strides = [1, 1]} : vector<8x256xf32> to vector<8x64xf32>
    %111 = vector.extract_strided_slice %108 {offsets = [0, 192], sizes = [8, 64], strides = [1, 1]} : vector<8x256xf32> to vector<8x64xf32>
    %112 = vector.extract_strided_slice %103 {offsets = [0, 128], sizes = [8, 64], strides = [1, 1]} : vector<8x256xf32> to vector<8x64xf32>
    %113 = math.tanh %112 : vector<8x64xf32>
    %114 = arith.mulf %110, %87 : vector<8x64xf32>
    %115 = arith.mulf %109, %113 : vector<8x64xf32>
    %116 = arith.addf %114, %115 : vector<8x64xf32>
    %117 = math.tanh %116 : vector<8x64xf32>
    %118 = arith.mulf %111, %117 : vector<8x64xf32>
    %119 = arith.index_cast %96 : i32 to index
    %c0_36 = arith.constant 0 : index
    %120 = vector.load %arg1[%119, %c0_36] : memref<64x64xf32, #tpu.memory_space<vmem>>, vector<8x64xf32>
    %121 = arith.mulf %120, %118 : vector<8x64xf32>
    %cst_37 = arith.constant 1.000000e+00 : f32
    %122 = vector.broadcast %cst_37 : f32 to vector<8x64xf32>
    %123 = arith.subf %122, %120 : vector<8x64xf32>
    %124 = arith.mulf %123, %82 : vector<8x64xf32>
    %125 = arith.addf %121, %124 : vector<8x64xf32>
    %126 = arith.mulf %120, %116 : vector<8x64xf32>
    %cst_38 = arith.constant 1.000000e+00 : f32
    %127 = vector.broadcast %cst_38 : f32 to vector<8x64xf32>
    %128 = arith.subf %127, %120 : vector<8x64xf32>
    %129 = arith.mulf %128, %87 : vector<8x64xf32>
    %130 = arith.addf %126, %129 : vector<8x64xf32>
    %131 = arith.mulf %120, %118 : vector<8x64xf32>
    %132 = vector.extract_strided_slice %131 {offsets = [0, 0], sizes = [8, 32], strides = [1, 1]} : vector<8x64xf32> to vector<8x32xf32>
    %133 = arith.index_cast %96 : i32 to index
    %c0_39 = arith.constant 0 : index
    %134 = vector.load %arg9[%133, %c0_39] : memref<64x32xf32, #tpu.memory_space<vmem>>, vector<8x32xf32>
    tpu.vector_store %arg9[%133, %c0_39], %132 {strides = array<i32>} : memref<64x32xf32, #tpu.memory_space<vmem>>, vector<8x32xf32>,
    %135 = vector.extract_strided_slice %131 {offsets = [0, 32], sizes = [8, 32], strides = [1, 1]} : vector<8x64xf32> to vector<8x32xf32>
    %136 = arith.index_cast %99 : i32 to index
    %c0_40 = arith.constant 0 : index
    %137 = vector.load %arg10[%136, %c0_40] : memref<64x32xf32, #tpu.memory_space<vmem>>, vector<8x32xf32>
    tpu.vector_store %arg10[%136, %c0_40], %135 {strides = array<i32>} : memref<64x32xf32, #tpu.memory_space<vmem>>, vector<8x32xf32>,
    %c3_i32 = arith.constant 3 : i32
    %c8_i32_41 = arith.constant 8 : i32
    %138 = arith.muli %c3_i32, %c8_i32_41 : i32
    %139 = tpu.assume_multiple %138, 8 : i32
    %c7_i32_42 = arith.constant 7 : i32
    %140 = arith.subi %c7_i32_42, %c3_i32 : i32
    %c8_i32_43 = arith.constant 8 : i32
    %141 = arith.muli %140, %c8_i32_43 : i32
    %142 = tpu.assume_multiple %141, 8 : i32
    %143 = arith.index_cast %139 : i32 to index
    %c0_44 = arith.constant 0 : index
    %144 = vector.load %arg8[%143, %c0_44] : memref<64x256xf32, #tpu.memory_space<vmem>>, vector<8x256xf32>
    %cst_45 = arith.constant dense<0.000000e+00> : vector<8x256xf32>
    %145 = tpu.matmul %125, %7, %cst_45 {dimension_numbers = #tpu.dot_dimension_numbers<[1], [0], [0], [1], [0, 0, 1, 1], [], []>} : vector<8x64xf32>, vector<64x256xf32>, vector<8x256xf32> -> vector<8x256xf32>
    %146 = arith.addf %144, %145 : vector<8x256xf32>
    %147 = arith.negf %146 : vector<8x256xf32>
    %148 = math.exp %147 : vector<8x256xf32>
    %cst_46 = arith.constant 1.000000e+00 : f32
    %149 = vector.broadcast %cst_46 : f32 to vector<8x256xf32>
    %150 = arith.addf %149, %148 : vector<8x256xf32>
    %151 = arith.divf %149, %150 : vector<8x256xf32>
    %152 = vector.extract_strided_slice %151 {offsets = [0, 0], sizes = [8, 64], strides = [1, 1]} : vector<8x256xf32> to vector<8x64xf32>
    %153 = vector.extract_strided_slice %151 {offsets = [0, 64], sizes = [8, 64], strides = [1, 1]} : vector<8x256xf32> to vector<8x64xf32>
    %154 = vector.extract_strided_slice %151 {offsets = [0, 192], sizes = [8, 64], strides = [1, 1]} : vector<8x256xf32> to vector<8x64xf32>
    %155 = vector.extract_strided_slice %146 {offsets = [0, 128], sizes = [8, 64], strides = [1, 1]} : vector<8x256xf32> to vector<8x64xf32>
    %156 = math.tanh %155 : vector<8x64xf32>
    %157 = arith.mulf %153, %130 : vector<8x64xf32>
    %158 = arith.mulf %152, %156 : vector<8x64xf32>
    %159 = arith.addf %157, %158 : vector<8x64xf32>
    %160 = math.tanh %159 : vector<8x64xf32>
    %161 = arith.mulf %154, %160 : vector<8x64xf32>
    %162 = arith.index_cast %139 : i32 to index
    %c0_47 = arith.constant 0 : index
    %163 = vector.load %arg1[%162, %c0_47] : memref<64x64xf32, #tpu.memory_space<vmem>>, vector<8x64xf32>
    %164 = arith.mulf %163, %161 : vector<8x64xf32>
    %cst_48 = arith.constant 1.000000e+00 : f32
    %165 = vector.broadcast %cst_48 : f32 to vector<8x64xf32>
    %166 = arith.subf %165, %163 : vector<8x64xf32>
    %167 = arith.mulf %166, %125 : vector<8x64xf32>
    %168 = arith.addf %164, %167 : vector<8x64xf32>
    %169 = arith.mulf %163, %159 : vector<8x64xf32>
    %cst_49 = arith.constant 1.000000e+00 : f32
    %170 = vector.broadcast %cst_49 : f32 to vector<8x64xf32>
    %171 = arith.subf %170, %163 : vector<8x64xf32>
    %172 = arith.mulf %171, %130 : vector<8x64xf32>
    %173 = arith.addf %169, %172 : vector<8x64xf32>
    %174 = arith.mulf %163, %161 : vector<8x64xf32>
    %175 = vector.extract_strided_slice %174 {offsets = [0, 0], sizes = [8, 32], strides = [1, 1]} : vector<8x64xf32> to vector<8x32xf32>
    %176 = arith.index_cast %139 : i32 to index
    %c0_50 = arith.constant 0 : index
    %177 = vector.load %arg9[%176, %c0_50] : memref<64x32xf32, #tpu.memory_space<vmem>>, vector<8x32xf32>
    tpu.vector_store %arg9[%176, %c0_50], %175 {strides = array<i32>} : memref<64x32xf32, #tpu.memory_space<vmem>>, vector<8x32xf32>,
    %178 = vector.extract_strided_slice %174 {offsets = [0, 32], sizes = [8, 32], strides = [1, 1]} : vector<8x64xf32> to vector<8x32xf32>
    %179 = arith.index_cast %142 : i32 to index
    %c0_51 = arith.constant 0 : index
    %180 = vector.load %arg10[%179, %c0_51] : memref<64x32xf32, #tpu.memory_space<vmem>>, vector<8x32xf32>
    tpu.vector_store %arg10[%179, %c0_51], %178 {strides = array<i32>} : memref<64x32xf32, #tpu.memory_space<vmem>>, vector<8x32xf32>,
    %c4_i32 = arith.constant 4 : i32
    %c8_i32_52 = arith.constant 8 : i32
    %181 = arith.muli %c4_i32, %c8_i32_52 : i32
    %182 = tpu.assume_multiple %181, 8 : i32
    %c7_i32_53 = arith.constant 7 : i32
    %183 = arith.subi %c7_i32_53, %c4_i32 : i32
    %c8_i32_54 = arith.constant 8 : i32
    %184 = arith.muli %183, %c8_i32_54 : i32
    %185 = tpu.assume_multiple %184, 8 : i32
    %186 = arith.index_cast %182 : i32 to index
    %c0_55 = arith.constant 0 : index
    %187 = vector.load %arg8[%186, %c0_55] : memref<64x256xf32, #tpu.memory_space<vmem>>, vector<8x256xf32>
    %cst_56 = arith.constant dense<0.000000e+00> : vector<8x256xf32>
    %188 = tpu.matmul %168, %7, %cst_56 {dimension_numbers = #tpu.dot_dimension_numbers<[1], [0], [0], [1], [0, 0, 1, 1], [], []>} : vector<8x64xf32>, vector<64x256xf32>, vector<8x256xf32> -> vector<8x256xf32>
    %189 = arith.addf %187, %188 : vector<8x256xf32>
    %190 = arith.negf %189 : vector<8x256xf32>
    %191 = math.exp %190 : vector<8x256xf32>
    %cst_57 = arith.constant 1.000000e+00 : f32
    %192 = vector.broadcast %cst_57 : f32 to vector<8x256xf32>
    %193 = arith.addf %192, %191 : vector<8x256xf32>
    %194 = arith.divf %192, %193 : vector<8x256xf32>
    %195 = vector.extract_strided_slice %194 {offsets = [0, 0], sizes = [8, 64], strides = [1, 1]} : vector<8x256xf32> to vector<8x64xf32>
    %196 = vector.extract_strided_slice %194 {offsets = [0, 64], sizes = [8, 64], strides = [1, 1]} : vector<8x256xf32> to vector<8x64xf32>
    %197 = vector.extract_strided_slice %194 {offsets = [0, 192], sizes = [8, 64], strides = [1, 1]} : vector<8x256xf32> to vector<8x64xf32>
    %198 = vector.extract_strided_slice %189 {offsets = [0, 128], sizes = [8, 64], strides = [1, 1]} : vector<8x256xf32> to vector<8x64xf32>
    %199 = math.tanh %198 : vector<8x64xf32>
    %200 = arith.mulf %196, %173 : vector<8x64xf32>
    %201 = arith.mulf %195, %199 : vector<8x64xf32>
    %202 = arith.addf %200, %201 : vector<8x64xf32>
    %203 = math.tanh %202 : vector<8x64xf32>
    %204 = arith.mulf %197, %203 : vector<8x64xf32>
    %205 = arith.index_cast %182 : i32 to index
    %c0_58 = arith.constant 0 : index
    %206 = vector.load %arg1[%205, %c0_58] : memref<64x64xf32, #tpu.memory_space<vmem>>, vector<8x64xf32>
    %207 = arith.mulf %206, %204 : vector<8x64xf32>
    %cst_59 = arith.constant 1.000000e+00 : f32
    %208 = vector.broadcast %cst_59 : f32 to vector<8x64xf32>
    %209 = arith.subf %208, %206 : vector<8x64xf32>
    %210 = arith.mulf %209, %168 : vector<8x64xf32>
    %211 = arith.addf %207, %210 : vector<8x64xf32>
    %212 = arith.mulf %206, %202 : vector<8x64xf32>
    %cst_60 = arith.constant 1.000000e+00 : f32
    %213 = vector.broadcast %cst_60 : f32 to vector<8x64xf32>
    %214 = arith.subf %213, %206 : vector<8x64xf32>
    %215 = arith.mulf %214, %173 : vector<8x64xf32>
    %216 = arith.addf %212, %215 : vector<8x64xf32>
    %217 = arith.mulf %206, %204 : vector<8x64xf32>
    %218 = vector.extract_strided_slice %217 {offsets = [0, 0], sizes = [8, 32], strides = [1, 1]} : vector<8x64xf32> to vector<8x32xf32>
    %219 = arith.index_cast %182 : i32 to index
    %c0_61 = arith.constant 0 : index
    %220 = vector.load %arg9[%219, %c0_61] : memref<64x32xf32, #tpu.memory_space<vmem>>, vector<8x32xf32>
    tpu.vector_store %arg9[%219, %c0_61], %218 {strides = array<i32>} : memref<64x32xf32, #tpu.memory_space<vmem>>, vector<8x32xf32>,
    %221 = vector.extract_strided_slice %217 {offsets = [0, 32], sizes = [8, 32], strides = [1, 1]} : vector<8x64xf32> to vector<8x32xf32>
    %222 = arith.index_cast %185 : i32 to index
    %c0_62 = arith.constant 0 : index
    %223 = vector.load %arg10[%222, %c0_62] : memref<64x32xf32, #tpu.memory_space<vmem>>, vector<8x32xf32>
    tpu.vector_store %arg10[%222, %c0_62], %221 {strides = array<i32>} : memref<64x32xf32, #tpu.memory_space<vmem>>, vector<8x32xf32>,
    %c5_i32 = arith.constant 5 : i32
    %c8_i32_63 = arith.constant 8 : i32
    %224 = arith.muli %c5_i32, %c8_i32_63 : i32
    %225 = tpu.assume_multiple %224, 8 : i32
    %c7_i32_64 = arith.constant 7 : i32
    %226 = arith.subi %c7_i32_64, %c5_i32 : i32
    %c8_i32_65 = arith.constant 8 : i32
    %227 = arith.muli %226, %c8_i32_65 : i32
    %228 = tpu.assume_multiple %227, 8 : i32
    %229 = arith.index_cast %225 : i32 to index
    %c0_66 = arith.constant 0 : index
    %230 = vector.load %arg8[%229, %c0_66] : memref<64x256xf32, #tpu.memory_space<vmem>>, vector<8x256xf32>
    %cst_67 = arith.constant dense<0.000000e+00> : vector<8x256xf32>
    %231 = tpu.matmul %211, %7, %cst_67 {dimension_numbers = #tpu.dot_dimension_numbers<[1], [0], [0], [1], [0, 0, 1, 1], [], []>} : vector<8x64xf32>, vector<64x256xf32>, vector<8x256xf32> -> vector<8x256xf32>
    %232 = arith.addf %230, %231 : vector<8x256xf32>
    %233 = arith.negf %232 : vector<8x256xf32>
    %234 = math.exp %233 : vector<8x256xf32>
    %cst_68 = arith.constant 1.000000e+00 : f32
    %235 = vector.broadcast %cst_68 : f32 to vector<8x256xf32>
    %236 = arith.addf %235, %234 : vector<8x256xf32>
    %237 = arith.divf %235, %236 : vector<8x256xf32>
    %238 = vector.extract_strided_slice %237 {offsets = [0, 0], sizes = [8, 64], strides = [1, 1]} : vector<8x256xf32> to vector<8x64xf32>
    %239 = vector.extract_strided_slice %237 {offsets = [0, 64], sizes = [8, 64], strides = [1, 1]} : vector<8x256xf32> to vector<8x64xf32>
    %240 = vector.extract_strided_slice %237 {offsets = [0, 192], sizes = [8, 64], strides = [1, 1]} : vector<8x256xf32> to vector<8x64xf32>
    %241 = vector.extract_strided_slice %232 {offsets = [0, 128], sizes = [8, 64], strides = [1, 1]} : vector<8x256xf32> to vector<8x64xf32>
    %242 = math.tanh %241 : vector<8x64xf32>
    %243 = arith.mulf %239, %216 : vector<8x64xf32>
    %244 = arith.mulf %238, %242 : vector<8x64xf32>
    %245 = arith.addf %243, %244 : vector<8x64xf32>
    %246 = math.tanh %245 : vector<8x64xf32>
    %247 = arith.mulf %240, %246 : vector<8x64xf32>
    %248 = arith.index_cast %225 : i32 to index
    %c0_69 = arith.constant 0 : index
    %249 = vector.load %arg1[%248, %c0_69] : memref<64x64xf32, #tpu.memory_space<vmem>>, vector<8x64xf32>
    %250 = arith.mulf %249, %247 : vector<8x64xf32>
    %cst_70 = arith.constant 1.000000e+00 : f32
    %251 = vector.broadcast %cst_70 : f32 to vector<8x64xf32>
    %252 = arith.subf %251, %249 : vector<8x64xf32>
    %253 = arith.mulf %252, %211 : vector<8x64xf32>
    %254 = arith.addf %250, %253 : vector<8x64xf32>
    %255 = arith.mulf %249, %245 : vector<8x64xf32>
    %cst_71 = arith.constant 1.000000e+00 : f32
    %256 = vector.broadcast %cst_71 : f32 to vector<8x64xf32>
    %257 = arith.subf %256, %249 : vector<8x64xf32>
    %258 = arith.mulf %257, %216 : vector<8x64xf32>
    %259 = arith.addf %255, %258 : vector<8x64xf32>
    %260 = arith.mulf %249, %247 : vector<8x64xf32>
    %261 = vector.extract_strided_slice %260 {offsets = [0, 0], sizes = [8, 32], strides = [1, 1]} : vector<8x64xf32> to vector<8x32xf32>
    %262 = arith.index_cast %225 : i32 to index
    %c0_72 = arith.constant 0 : index
    %263 = vector.load %arg9[%262, %c0_72] : memref<64x32xf32, #tpu.memory_space<vmem>>, vector<8x32xf32>
    tpu.vector_store %arg9[%262, %c0_72], %261 {strides = array<i32>} : memref<64x32xf32, #tpu.memory_space<vmem>>, vector<8x32xf32>,
    %264 = vector.extract_strided_slice %260 {offsets = [0, 32], sizes = [8, 32], strides = [1, 1]} : vector<8x64xf32> to vector<8x32xf32>
    %265 = arith.index_cast %228 : i32 to index
    %c0_73 = arith.constant 0 : index
    %266 = vector.load %arg10[%265, %c0_73] : memref<64x32xf32, #tpu.memory_space<vmem>>, vector<8x32xf32>
    tpu.vector_store %arg10[%265, %c0_73], %264 {strides = array<i32>} : memref<64x32xf32, #tpu.memory_space<vmem>>, vector<8x32xf32>,
    %c6_i32 = arith.constant 6 : i32
    %c8_i32_74 = arith.constant 8 : i32
    %267 = arith.muli %c6_i32, %c8_i32_74 : i32
    %268 = tpu.assume_multiple %267, 8 : i32
    %c7_i32_75 = arith.constant 7 : i32
    %269 = arith.subi %c7_i32_75, %c6_i32 : i32
    %c8_i32_76 = arith.constant 8 : i32
    %270 = arith.muli %269, %c8_i32_76 : i32
    %271 = tpu.assume_multiple %270, 8 : i32
    %272 = arith.index_cast %268 : i32 to index
    %c0_77 = arith.constant 0 : index
    %273 = vector.load %arg8[%272, %c0_77] : memref<64x256xf32, #tpu.memory_space<vmem>>, vector<8x256xf32>
    %cst_78 = arith.constant dense<0.000000e+00> : vector<8x256xf32>
    %274 = tpu.matmul %254, %7, %cst_78 {dimension_numbers = #tpu.dot_dimension_numbers<[1], [0], [0], [1], [0, 0, 1, 1], [], []>} : vector<8x64xf32>, vector<64x256xf32>, vector<8x256xf32> -> vector<8x256xf32>
    %275 = arith.addf %273, %274 : vector<8x256xf32>
    %276 = arith.negf %275 : vector<8x256xf32>
    %277 = math.exp %276 : vector<8x256xf32>
    %cst_79 = arith.constant 1.000000e+00 : f32
    %278 = vector.broadcast %cst_79 : f32 to vector<8x256xf32>
    %279 = arith.addf %278, %277 : vector<8x256xf32>
    %280 = arith.divf %278, %279 : vector<8x256xf32>
    %281 = vector.extract_strided_slice %280 {offsets = [0, 0], sizes = [8, 64], strides = [1, 1]} : vector<8x256xf32> to vector<8x64xf32>
    %282 = vector.extract_strided_slice %280 {offsets = [0, 64], sizes = [8, 64], strides = [1, 1]} : vector<8x256xf32> to vector<8x64xf32>
    %283 = vector.extract_strided_slice %280 {offsets = [0, 192], sizes = [8, 64], strides = [1, 1]} : vector<8x256xf32> to vector<8x64xf32>
    %284 = vector.extract_strided_slice %275 {offsets = [0, 128], sizes = [8, 64], strides = [1, 1]} : vector<8x256xf32> to vector<8x64xf32>
    %285 = math.tanh %284 : vector<8x64xf32>
    %286 = arith.mulf %282, %259 : vector<8x64xf32>
    %287 = arith.mulf %281, %285 : vector<8x64xf32>
    %288 = arith.addf %286, %287 : vector<8x64xf32>
    %289 = math.tanh %288 : vector<8x64xf32>
    %290 = arith.mulf %283, %289 : vector<8x64xf32>
    %291 = arith.index_cast %268 : i32 to index
    %c0_80 = arith.constant 0 : index
    %292 = vector.load %arg1[%291, %c0_80] : memref<64x64xf32, #tpu.memory_space<vmem>>, vector<8x64xf32>
    %293 = arith.mulf %292, %290 : vector<8x64xf32>
    %cst_81 = arith.constant 1.000000e+00 : f32
    %294 = vector.broadcast %cst_81 : f32 to vector<8x64xf32>
    %295 = arith.subf %294, %292 : vector<8x64xf32>
    %296 = arith.mulf %295, %254 : vector<8x64xf32>
    %297 = arith.addf %293, %296 : vector<8x64xf32>
    %298 = arith.mulf %292, %288 : vector<8x64xf32>
    %cst_82 = arith.constant 1.000000e+00 : f32
    %299 = vector.broadcast %cst_82 : f32 to vector<8x64xf32>
    %300 = arith.subf %299, %292 : vector<8x64xf32>
    %301 = arith.mulf %300, %259 : vector<8x64xf32>
    %302 = arith.addf %298, %301 : vector<8x64xf32>
    %303 = arith.mulf %292, %290 : vector<8x64xf32>
    %304 = vector.extract_strided_slice %303 {offsets = [0, 0], sizes = [8, 32], strides = [1, 1]} : vector<8x64xf32> to vector<8x32xf32>
    %305 = arith.index_cast %268 : i32 to index
    %c0_83 = arith.constant 0 : index
    %306 = vector.load %arg9[%305, %c0_83] : memref<64x32xf32, #tpu.memory_space<vmem>>, vector<8x32xf32>
    tpu.vector_store %arg9[%305, %c0_83], %304 {strides = array<i32>} : memref<64x32xf32, #tpu.memory_space<vmem>>, vector<8x32xf32>,
    %307 = vector.extract_strided_slice %303 {offsets = [0, 32], sizes = [8, 32], strides = [1, 1]} : vector<8x64xf32> to vector<8x32xf32>
    %308 = arith.index_cast %271 : i32 to index
    %c0_84 = arith.constant 0 : index
    %309 = vector.load %arg10[%308, %c0_84] : memref<64x32xf32, #tpu.memory_space<vmem>>, vector<8x32xf32>
    tpu.vector_store %arg10[%308, %c0_84], %307 {strides = array<i32>} : memref<64x32xf32, #tpu.memory_space<vmem>>, vector<8x32xf32>,
    %c7_i32_85 = arith.constant 7 : i32
    %c8_i32_86 = arith.constant 8 : i32
    %310 = arith.muli %c7_i32_85, %c8_i32_86 : i32
    %311 = tpu.assume_multiple %310, 8 : i32
    %c7_i32_87 = arith.constant 7 : i32
    %312 = arith.subi %c7_i32_87, %c7_i32_85 : i32
    %c8_i32_88 = arith.constant 8 : i32
    %313 = arith.muli %312, %c8_i32_88 : i32
    %314 = tpu.assume_multiple %313, 8 : i32
    %315 = arith.index_cast %311 : i32 to index
    %c0_89 = arith.constant 0 : index
    %316 = vector.load %arg8[%315, %c0_89] : memref<64x256xf32, #tpu.memory_space<vmem>>, vector<8x256xf32>
    %cst_90 = arith.constant dense<0.000000e+00> : vector<8x256xf32>
    %317 = tpu.matmul %297, %7, %cst_90 {dimension_numbers = #tpu.dot_dimension_numbers<[1], [0], [0], [1], [0, 0, 1, 1], [], []>} : vector<8x64xf32>, vector<64x256xf32>, vector<8x256xf32> -> vector<8x256xf32>
    %318 = arith.addf %316, %317 : vector<8x256xf32>
    %319 = arith.negf %318 : vector<8x256xf32>
    %320 = math.exp %319 : vector<8x256xf32>
    %cst_91 = arith.constant 1.000000e+00 : f32
    %321 = vector.broadcast %cst_91 : f32 to vector<8x256xf32>
    %322 = arith.addf %321, %320 : vector<8x256xf32>
    %323 = arith.divf %321, %322 : vector<8x256xf32>
    %324 = vector.extract_strided_slice %323 {offsets = [0, 0], sizes = [8, 64], strides = [1, 1]} : vector<8x256xf32> to vector<8x64xf32>
    %325 = vector.extract_strided_slice %323 {offsets = [0, 64], sizes = [8, 64], strides = [1, 1]} : vector<8x256xf32> to vector<8x64xf32>
    %326 = vector.extract_strided_slice %323 {offsets = [0, 192], sizes = [8, 64], strides = [1, 1]} : vector<8x256xf32> to vector<8x64xf32>
    %327 = vector.extract_strided_slice %318 {offsets = [0, 128], sizes = [8, 64], strides = [1, 1]} : vector<8x256xf32> to vector<8x64xf32>
    %328 = math.tanh %327 : vector<8x64xf32>
    %329 = arith.mulf %325, %302 : vector<8x64xf32>
    %330 = arith.mulf %324, %328 : vector<8x64xf32>
    %331 = arith.addf %329, %330 : vector<8x64xf32>
    %332 = math.tanh %331 : vector<8x64xf32>
    %333 = arith.mulf %326, %332 : vector<8x64xf32>
    %334 = arith.index_cast %311 : i32 to index
    %c0_92 = arith.constant 0 : index
    %335 = vector.load %arg1[%334, %c0_92] : memref<64x64xf32, #tpu.memory_space<vmem>>, vector<8x64xf32>
    %336 = arith.mulf %335, %333 : vector<8x64xf32>
    %cst_93 = arith.constant 1.000000e+00 : f32
    %337 = vector.broadcast %cst_93 : f32 to vector<8x64xf32>
    %338 = arith.subf %337, %335 : vector<8x64xf32>
    %339 = arith.mulf %338, %297 : vector<8x64xf32>
    %340 = arith.addf %336, %339 : vector<8x64xf32>
    %341 = arith.mulf %335, %331 : vector<8x64xf32>
    %cst_94 = arith.constant 1.000000e+00 : f32
    %342 = vector.broadcast %cst_94 : f32 to vector<8x64xf32>
    %343 = arith.subf %342, %335 : vector<8x64xf32>
    %344 = arith.mulf %343, %302 : vector<8x64xf32>
    %345 = arith.addf %341, %344 : vector<8x64xf32>
    %346 = arith.mulf %335, %333 : vector<8x64xf32>
    %347 = vector.extract_strided_slice %346 {offsets = [0, 0], sizes = [8, 32], strides = [1, 1]} : vector<8x64xf32> to vector<8x32xf32>
    %348 = arith.index_cast %311 : i32 to index
    %c0_95 = arith.constant 0 : index
    %349 = vector.load %arg9[%348, %c0_95] : memref<64x32xf32, #tpu.memory_space<vmem>>, vector<8x32xf32>
    tpu.vector_store %arg9[%348, %c0_95], %347 {strides = array<i32>} : memref<64x32xf32, #tpu.memory_space<vmem>>, vector<8x32xf32>,
    %350 = vector.extract_strided_slice %346 {offsets = [0, 32], sizes = [8, 32], strides = [1, 1]} : vector<8x64xf32> to vector<8x32xf32>
    %351 = arith.index_cast %314 : i32 to index
    %c0_96 = arith.constant 0 : index
    %352 = vector.load %arg10[%351, %c0_96] : memref<64x32xf32, #tpu.memory_space<vmem>>, vector<8x32xf32>
    tpu.vector_store %arg10[%351, %c0_96], %350 {strides = array<i32>} : memref<64x32xf32, #tpu.memory_space<vmem>>, vector<8x32xf32>,
    %c8_i32_97 = arith.constant 8 : i32
    %c0_98 = arith.constant 0 : index
    %c0_99 = arith.constant 0 : index
    %353 = vector.load %arg9[%c0_98, %c0_99] : memref<64x32xf32, #tpu.memory_space<vmem>>, vector<64x32xf32>
    %c0_100 = arith.constant 0 : index
    %c0_101 = arith.constant 0 : index
    %354 = vector.load %arg5[%c0_100, %c0_101] : memref<64x10xf32, #tpu.memory_space<vmem>>, vector<32x10xf32>
    %cst_102 = arith.constant dense<0.000000e+00> : vector<64x10xf32>
    %355 = tpu.matmul %353, %354, %cst_102 {dimension_numbers = #tpu.dot_dimension_numbers<[1], [0], [0], [1], [0, 0, 1, 1], [], []>} : vector<64x32xf32>, vector<32x10xf32>, vector<64x10xf32> -> vector<64x10xf32>
    %c0_103 = arith.constant 0 : index
    %c0_104 = arith.constant 0 : index
    %356 = vector.load %arg10[%c0_103, %c0_104] : memref<64x32xf32, #tpu.memory_space<vmem>>, vector<64x32xf32>
    %c32 = arith.constant 32 : index
    %c0_105 = arith.constant 0 : index
    %357 = vector.load %arg5[%c32, %c0_105] : memref<64x10xf32, #tpu.memory_space<vmem>>, vector<32x10xf32>
    %cst_106 = arith.constant dense<0.000000e+00> : vector<64x10xf32>
    %358 = tpu.matmul %356, %357, %cst_106 {dimension_numbers = #tpu.dot_dimension_numbers<[1], [0], [0], [1], [0, 0, 1, 1], [], []>} : vector<64x32xf32>, vector<32x10xf32>, vector<64x10xf32> -> vector<64x10xf32>
    %359 = arith.addf %355, %358 : vector<64x10xf32>
    %c0_107 = arith.constant 0 : index
    %c0_108 = arith.constant 0 : index
    %360 = vector.load %arg6[%c0_107, %c0_108] : memref<1x10xf32, #tpu.memory_space<vmem>>, vector<1x10xf32>
    %361 = vector.broadcast %360 : vector<1x10xf32> to vector<64x10xf32>
    %362 = arith.addf %359, %361 : vector<64x10xf32>
    %cst_109 = arith.constant dense<0xFF800000> : vector<64xf32>
    %363 = vector.multi_reduction <maximumf>, %362, %cst_109 [1] : vector<64x10xf32> to vector<64xf32>
    %364 = vector.shape_cast %363 : vector<64xf32> to vector<64x1xf32>
    %365 = vector.broadcast %364 : vector<64x1xf32> to vector<64x10xf32>
    %366 = arith.subf %362, %365 : vector<64x10xf32>
    %367 = math.exp %366 : vector<64x10xf32>
    %cst_110 = arith.constant dense<0.000000e+00> : vector<64xf32>
    %368 = vector.multi_reduction <add>, %367, %cst_110 [1] : vector<64x10xf32> to vector<64xf32>
    %369 = vector.shape_cast %368 : vector<64xf32> to vector<64x1xf32>
    %370 = math.log %369 : vector<64x1xf32>
    %371 = vector.broadcast %370 : vector<64x1xf32> to vector<64x10xf32>
    %372 = arith.subf %366, %371 : vector<64x10xf32>
    %c0_111 = arith.constant 0 : index
    %c0_112 = arith.constant 0 : index
    %373 = vector.load %arg7[%c0_111, %c0_112] : memref<64x10xf32, #tpu.memory_space<vmem>>, vector<64x10xf32>
    tpu.vector_store %arg7[%c0_111, %c0_112], %372 {strides = array<i32>} : memref<64x10xf32, #tpu.memory_space<vmem>>, vector<64x10xf32>,
    return
  }
}

</mosaic_0001>

<bundles_post_ra>
// kernel: tpu_custom_call.1
= control target key start
LH: loop header
LB: loop body
LE: loop exit
PB: predicated region body
PF: predicated region fallthrough
CT: control target
= control target key end

     0   :  { %12 = vsyncpa [#allocation6], 0  ;;  %s2383_s0 = inlined_call_operand.vmem [shape: f32[64,64], index: 0, kind: input, shape index: {}]   ;;  %s2384_s1 = inlined_call_operand.hbm [shape: f32[64,64], index: 1, kind: input, shape index: {}]   ;;  %s2385_s2 = inlined_call_operand.hbm [shape: f32[64,256], index: 2, kind: input, shape index: {}]   ;;  %s2386_s3 = inlined_call_operand.hbm [shape: f32[64,256], index: 3, kind: input, shape index: {}]   ;;  %s2387_s4 = inlined_call_operand.vmem [shape: f32[1,256], index: 4, kind: input, shape index: {}]   ;;  %s2388_s5 = inlined_call_operand.vmem [shape: f32[64,10], index: 5, kind: input, shape index: {}]   ;;  %s2389_s6 = inlined_call_operand.vmem [shape: f32[1,10], index: 6, kind: input, shape index: {}]   ;;  %s2390_s7 = inlined_call_operand.vmem [shape: f32[64,10], index: 7, kind: output, shape index: {}]  }
   0x1   :  { %13 = vsyncpa [#allocation8], 0  ;;  %s33_s26 = sshll.u32 %s2385_s2, 4  ;;  %s1818_s27 = smov [#allocation7]   ;;  %s34_s26 = int_to_ptr.hbm [resolvable:$true] %s33_s26 }
   0x2   :  { %s35_s28 = sshll.u32 %s1818_s27, 4  ;;  %s20_s8 = sshll.u32 %s2384_s1, 4  ;;  %s36_s28 = int_to_ptr.vmem [resolvable:$true] %s35_s28  ;;  %s21_s8 = int_to_ptr.hbm [resolvable:$true] %s20_s8 }
   0x3   :  { %s1819_s9 = smov 256   ;;  %s1820_s10 = smov 16  }
   0x4   :  { %41 = dma.hbm_to_vmem [thread:$0]  %s34_s26, 2048, %s36_s28, [#allocation8], %s1819_s9, %s1819_s9, %s1820_s10  }
   0x5   :  { %s1821_s11 = smov [#allocation5]   ;;  %s1822_s13 = smov 128  }
   0x6   :  { %s22_s12 = sshll.u32 %s1821_s11, 4  ;;  %s1823_s14 = smov 8   ;;  %s23_s12 = int_to_ptr.vmem [resolvable:$true] %s22_s12 }
   0x7   :  { %28 = dma.hbm_to_vmem [thread:$0]  %s21_s8, 1024, %s23_s12, [#allocation6], %s1822_s13, %s1822_s13, %s1823_s14  }
   0x8   :  { %s46_s16 = sshll.u32 %s2386_s3, 4  ;;  %s1824_s17 = smov [#allocation9]   ;;  %s47_s16 = int_to_ptr.hbm [resolvable:$true] %s46_s16 }
   0x9   :  { %s48_s18 = sshll.u32 %s1824_s17, 4  ;;  %s49_s18 = int_to_ptr.vmem [resolvable:$true] %s48_s18 }
   0xa   :  { %54 = dma.hbm_to_vmem [thread:$0]  %s47_s16, 2048, %s49_s18, [#allocation8], %s1819_s9, %s1819_s9, %s1820_s10  }
   0xb   :  { %1814 = dma.done.wait [#allocation6], 1024  }
   0xc   :  { %1815 = vsyncadd [#allocation6], 4294966272 }
   0xd   :  { %1816 = dma.done.wait [#allocation8], 4096  }
   0xe   :  { %1817 = vsyncadd [#allocation8], 4294963200  ;;  %v95_v0 = vld [vmem:[#allocation7 + $0x70] sm:$0xff]  ;;  %v93_v1 = vld [vmem:[#allocation7 + $0x60] sm:$0xff]  ;;  %vm103_vm0 = vcmask 523264   ;;  %v1825_v37 = vmov 0.0  }
   0xf   :  { %1587 = vmatpush.msra.mxu2 %v95_v0  ;;  %v96_v2 = vld [vmem:[#allocation7 + $0x78] sm:$0xff]  ;;  %136 = vmatpush.msra.mxu0 %v95_v0  ;;  %v91_v3 = vld [vmem:[#allocation7 + $0x50] sm:$0xff]  ;;  %v94_v4 = vld [vmem:[#allocation7 + $0x68] sm:$0xff]  ;;  %vm355_vm9 = vcmask 261120   ;;  %s1827_s18 = smov 96  }
  0x10   :  { %1595 = vmatpush.msra.mxu3 %v96_v2  ;;  %177 = vmatpush.msra.mxu1 %v96_v2  ;;  %v92_v5 = vld [vmem:[#allocation7 + $0x58] sm:$0xff]  ;;  %v89_v6 = vld [vmem:[#allocation7 + $0x40] sm:$0xff]  ;;  %v90_v7 = vld [vmem:[#allocation7 + $0x48] sm:$0xff] }
  0x11   :  { %1588 = vmatpush.msra.mxu2 %v93_v1  ;;  %137 = vmatpush.msra.mxu0 %v93_v1  ;;  %v87_v8 = vld [vmem:[#allocation7 + $0x30] sm:$0xff]  ;;  %v88_v9 = vld [vmem:[#allocation7 + $0x38] sm:$0xff]  ;;  %v85_v10 = vld [vmem:[#allocation7 + $0x20] sm:$0xff] }
  0x12   :  { %1596 = vmatpush.msra.mxu3 %v94_v4  ;;  %178 = vmatpush.msra.mxu1 %v94_v4  ;;  %v86_v11 = vld [vmem:[#allocation7 + $0x28] sm:$0xff]  ;;  %v83_v12 = vld [vmem:[#allocation7 + $0x10] sm:$0xff]  ;;  %v84_v13 = vld [vmem:[#allocation7 + $0x18] sm:$0xff] }
  0x13   :  { %1589 = vmatpush.msra.mxu2 %v91_v3  ;;  %138 = vmatpush.msra.mxu0 %v91_v3  ;;  %v81_v14 = vld [vmem:[#allocation7] sm:$0xff]  ;;  %v82_v16 = vld [vmem:[#allocation7 + $0x8] sm:$0xff]  ;;  %v1880_v17 = vld [vmem:[#allocation9 + $0x70] sm:$0xff] }
  0x14   :  { %1597 = vmatpush.msra.mxu3 %v92_v5  ;;  %179 = vmatpush.msra.mxu1 %v92_v5  ;;  %v77_v15 = vld [vmem:[%s2383_s0 + $0x20] sm:$0xff]  ;;  %v1882_v18 = vld [vmem:[#allocation9 + $0x78] sm:$0xff]  ;;  %v1892_v21 = vld [vmem:[#allocation9 + $0x68] sm:$0xff] }
  0x15   :  { %1590 = vmatpush.msra.mxu2 %v89_v6  ;;  %139 = vmatpush.msra.mxu0 %v89_v6  ;;  %v1885_v19 = vld [vmem:[#allocation9 + $0x60] sm:$0xff]  ;;  %v1894_v22 = vld [vmem:[#allocation9 + $0x50] sm:$0xff]  ;;  %v1899_v23 = vld [vmem:[#allocation9 + $0x58] sm:$0xff] }
  0x16   :  { %1598 = vmatpush.msra.mxu3 %v90_v7  ;;  %180 = vmatpush.msra.mxu1 %v90_v7  ;;  %v73_v20 = vld [vmem:[%s2383_s0] sm:$0xff]  ;;  %v78_v25 = vld [vmem:[%s2383_s0 + $0x28] sm:$0xff]  ;;  %v1912_v27 = vld [vmem:[#allocation9 + $0x30] sm:$0xff] }
  0x17   :  { %1591 = vmatpush.msra.mxu2 %v87_v8  ;;  %140 = vmatpush.msra.mxu0 %v87_v8  ;;  %v1901_v24 = vld [vmem:[#allocation9 + $0x40] sm:$0xff]  ;;  %v1909_v26 = vld [vmem:[#allocation9 + $0x48] sm:$0xff]  ;;  %v1917_v28 = vld [vmem:[#allocation9 + $0x38] sm:$0xff] }
  0x18   :  { %1599 = vmatpush.msra.mxu3 %v88_v9  ;;  %181 = vmatpush.msra.mxu1 %v88_v9  ;;  %v1921_v29 = vld [vmem:[#allocation9 + $0x20] sm:$0xff]  ;;  %v1926_v30 = vld [vmem:[#allocation9 + $0x28] sm:$0xff]  ;;  %v1928_v31 = vld [vmem:[#allocation9 + $0x10] sm:$0xff] }
  0x19   :  { %1592 = vmatpush.msra.mxu2 %v85_v10  ;;  %141 = vmatpush.msra.mxu0 %v85_v10  ;;  %v1933_v32 = vld [vmem:[#allocation9 + $0x18] sm:$0xff]  ;;  %v1936_v33 = vld [vmem:[#allocation9] sm:$0xff]  ;;  %v79_v34 = vld [vmem:[%s2383_s0 + $0x30] sm:$0xff] }
  0x1a   :  { %1600 = vmatpush.msra.mxu3 %v86_v11  ;;  %182 = vmatpush.msra.mxu1 %v86_v11  ;;  %v1944_v35 = vld [vmem:[#allocation9 + $0x8] sm:$0xff]  ;;  %v80_v36 = vld [vmem:[%s2383_s0 + $0x38] sm:$0xff]  ;;  %v97_v43 = vld [vmem:[%s2387_s4] sm:$0x3]  ;;  %s1826_s4 = smov 64  }
  0x1b   :  { %1593 = vmatpush.msra.mxu2 %v83_v12  ;;  %142 = vmatpush.msra.mxu0 %v83_v12  ;;  %v2029_v46 = vperm.slane %v97_v43, 0  ;;  %v2036_v56 = vperm.slane %v97_v43, 1 }
  0x1c   :  { %1601 = vmatpush.msra.mxu3 %v84_v13  ;;  %183 = vmatpush.msra.mxu1 %v84_v13 }
  0x1d   :  { %1594 = vmatpush.msra.mxu2 %v81_v14  ;;  %143 = vmatpush.msra.mxu0 %v81_v14 }
  0x1e   :  { %1529 = vmatmul.msk.f32.vlgmr.msra.gmra.mxu2 %vm103_vm0, %v77_v15  ;;  %1602 = vmatpush.msra.mxu3 %v82_v16 }
  0x1f   :  { %258 = vmatpush.msrb.mxu2 %v1880_v17  ;;  %1537 = vmatmul.msk.f32.vlgmr.msra.gmra.mxu3 %vm103_vm0, %v77_v15 }
  0x20   :  { %278 = vmatpush.msrb.mxu3 %v1882_v18  ;;  %1525 = vmatmul.msk.f32.vlgmr.msra.gmra.mxu0 %vm103_vm0, %v73_v20 }
  0x21   :  { %259 = vmatpush.msrb.mxu2 %v1885_v19  ;;  %184 = vmatpush.msra.mxu1 %v82_v16 }
  0x22   :  { %279 = vmatpush.msrb.mxu3 %v1892_v21  ;;  %1533 = vmatmul.msk.f32.vlgmr.msra.gmra.mxu1 %vm103_vm0, %v73_v20 }
  0x23   :  { %260 = vmatpush.msrb.mxu2 %v1894_v22  ;;  %760 = vmatpush.msrb.mxu0 %v1880_v17 }
  0x24   :  { %280 = vmatpush.msrb.mxu3 %v1899_v23  ;;  %780 = vmatpush.msrb.mxu1 %v1882_v18 }
  0x25   :  { %261 = vmatpush.msrb.mxu2 %v1901_v24  ;;  %761 = vmatpush.msrb.mxu0 %v1885_v19 }
  0x26   :  { %1530 = vmatmul.msk.f32.gmra.mxu2 %vm103_vm0, %v78_v25  ;;  %281 = vmatpush.msrb.mxu3 %v1909_v26 }
  0x27   :  { %1538 = vmatmul.msk.f32.gmra.mxu3 %vm103_vm0, %v78_v25  ;;  %262 = vmatpush.msrb.mxu2 %v1912_v27 }
  0x28   :  { %282 = vmatpush.msrb.mxu3 %v1917_v28  ;;  %762 = vmatpush.msrb.mxu0 %v1894_v22 }
  0x29   :  { %263 = vmatpush.msrb.mxu2 %v1921_v29  ;;  %781 = vmatpush.msrb.mxu1 %v1892_v21 }
  0x2a   :  { %283 = vmatpush.msrb.mxu3 %v1926_v30  ;;  %763 = vmatpush.msrb.mxu0 %v1901_v24 }
  0x2b   :  { %264 = vmatpush.msrb.mxu2 %v1928_v31  ;;  %782 = vmatpush.msrb.mxu1 %v1899_v23 }
  0x2c   :  { %284 = vmatpush.msrb.mxu3 %v1933_v32  ;;  %764 = vmatpush.msrb.mxu0 %v1912_v27 }
  0x2d   :  { %265 = vmatpush.msrb.mxu2 %v1936_v33  ;;  %783 = vmatpush.msrb.mxu1 %v1909_v26 }
  0x2e   :  { %1531 = vmatmul.msk.f32.gmra.mxu2 %vm103_vm0, %v79_v34  ;;  %285 = vmatpush.msrb.mxu3 %v1944_v35 }
  0x2f   :  { %1539 = vmatmul.msk.f32.gmra.mxu3 %vm103_vm0, %v79_v34  ;;  %379 = vmatpush.msra.mxu2 %v1880_v17 }
  0x30   :  { %399 = vmatpush.msra.mxu3 %v1882_v18  ;;  %765 = vmatpush.msrb.mxu0 %v1921_v29 }
  0x31   :  { %380 = vmatpush.msra.mxu2 %v1885_v19  ;;  %784 = vmatpush.msrb.mxu1 %v1917_v28 }
  0x32   :  { %400 = vmatpush.msra.mxu3 %v1892_v21  ;;  %766 = vmatpush.msrb.mxu0 %v1928_v31 }
  0x33   :  { %381 = vmatpush.msra.mxu2 %v1894_v22  ;;  %785 = vmatpush.msrb.mxu1 %v1926_v30 }
  0x34   :  { %401 = vmatpush.msra.mxu3 %v1899_v23  ;;  %767 = vmatpush.msrb.mxu0 %v1936_v33 }
  0x35   :  { %382 = vmatpush.msra.mxu2 %v1901_v24  ;;  %786 = vmatpush.msrb.mxu1 %v1933_v32 }
  0x36   :  { %1532 = vmatmul.msk.f32.gmra.mxu2 %vm103_vm0, %v80_v36  ;;  %402 = vmatpush.msra.mxu3 %v1909_v26 }
  0x37   :  { %1540 = vmatmul.msk.f32.gmra.mxu3 %vm103_vm0, %v80_v36  ;;  %383 = vmatpush.msra.mxu2 %v1912_v27 }
  0x38   :  { %403 = vmatpush.msra.mxu3 %v1917_v28  ;;  %787 = vmatpush.msrb.mxu1 %v1944_v35 }
  0x39   :  { %384 = vmatpush.msra.mxu2 %v1921_v29  ;;  %1014 = vmatpush.msra.mxu0 %v1880_v17 }
  0x3a   :  { %404 = vmatpush.msra.mxu3 %v1926_v30  ;;  %1034 = vmatpush.msra.mxu1 %v1882_v18 }
  0x3b   :  { %385 = vmatpush.msra.mxu2 %v1928_v31  ;;  %1015 = vmatpush.msra.mxu0 %v1885_v19 }
  0x3c   :  { %405 = vmatpush.msra.mxu3 %v1933_v32  ;;  %1035 = vmatpush.msra.mxu1 %v1892_v21 }
  0x3d   :  { %386 = vmatpush.msra.mxu2 %v1936_v33  ;;  %1016 = vmatpush.msra.mxu0 %v1894_v22 }
  0x3e   :  { %266 = vmatmul.f32.vlgmr.msrb.gmra.mxu2 %v1825_v37  ;;  %406 = vmatpush.msra.mxu3 %v1944_v35 }
  0x3f   :  { %286 = vmatmul.f32.vlgmr.msrb.gmra.mxu3 %v1825_v37  ;;  %506 = vmatpush.msrb.mxu2 %v1880_v17 }
  0x40   :  { %526 = vmatpush.msrb.mxu3 %v1882_v18  ;;  %1036 = vmatpush.msra.mxu1 %v1899_v23 }
  0x41   :  { %507 = vmatpush.msrb.mxu2 %v1885_v19  ;;  %1017 = vmatpush.msra.mxu0 %v1901_v24 }
  0x42   :  { %527 = vmatpush.msrb.mxu3 %v1892_v21  ;;  %1037 = vmatpush.msra.mxu1 %v1909_v26 }
  0x43   :  { %508 = vmatpush.msrb.mxu2 %v1894_v22  ;;  %1018 = vmatpush.msra.mxu0 %v1912_v27 }
  0x44   :  { %528 = vmatpush.msrb.mxu3 %v1899_v23  ;;  %1038 = vmatpush.msra.mxu1 %v1917_v28 }
  0x45   :  { %509 = vmatpush.msrb.mxu2 %v1901_v24  ;;  %1019 = vmatpush.msra.mxu0 %v1921_v29 }
  0x46   :  { %529 = vmatpush.msrb.mxu3 %v1909_v26  ;;  %1039 = vmatpush.msra.mxu1 %v1926_v30 }
  0x47   :  { %510 = vmatpush.msrb.mxu2 %v1912_v27  ;;  %1020 = vmatpush.msra.mxu0 %v1928_v31 }
  0x48   :  { %530 = vmatpush.msrb.mxu3 %v1917_v28  ;;  %1040 = vmatpush.msra.mxu1 %v1933_v32 }
  0x49   :  { %511 = vmatpush.msrb.mxu2 %v1921_v29  ;;  %1021 = vmatpush.msra.mxu0 %v1936_v33 }
  0x4a   :  { %531 = vmatpush.msrb.mxu3 %v1926_v30  ;;  %1041 = vmatpush.msra.mxu1 %v1944_v35 }
  0x4b   :  { %512 = vmatpush.msrb.mxu2 %v1928_v31 }
  0x4c   :  { %532 = vmatpush.msrb.mxu3 %v1933_v32 }
  0x4d   :  { %513 = vmatpush.msrb.mxu2 %v1936_v33 }
  0x4e   :  { %533 = vmatpush.msrb.mxu3 %v1944_v35 }
  0x9d   :  { %v145_v45 = vpop.f32.mrf.mxu0 }
  0x9e   :  { %v146_v48 = vadd.f32 %v145_v45, %v2029_v46 }
  0x9f   :  { %v186_v55 = vpop.f32.mrf.mxu1 }
  0xa0   :  { %v187_v57 = vadd.f32 %v186_v55, %v2036_v56 }
  0xa1   :  { %v2014_v38 = vpop.f32.mrf.mxu2 }
  0xa2   :  { %v2018_v40 = vpop.f32.mrf.mxu3 }
  0xa9   :  { %v2016_v39 = vpop.f32.mrf.mxu2 }
  0xaa   :  { %v2022_v42 = vpop.f32.mrf.mxu3 }
  0xb1   :  { %v2020_v41 = vpop.f32.mrf.mxu2 }
  0xb2   :  { %v2031_v47 = vpop.f32.mrf.mxu3 }
  0xb9   :  { %v2027_v44 = vpop.f32.mrf.mxu2 }
  0xba   :  { %v2034_v52 = vpop.f32.mrf.mxu3 }
  0xc1   :  { %v267_v49 = vpop.f32.mrf.mxu2 }
  0xc2   :  { %v290_v50 = vadd.f32 %v267_v49, %v146_v48  ;;  %v287_v58 = vpop.f32.mrf.mxu3 }
  0xc3   :  { %v291_v60 = vadd.f32 %v287_v58, %v187_v57 }
  0xc4   :  { %v1541_v51 = vmul.f32 -1.442695, %v290_v50  ;;  %v74_v50 = vld [vmem:[%s2383_s0 + $0x8] sm:$0xff] }
  0xc5   :  { %v1542_v8 = vmul.f32 -1.442695, %v291_v60  ;;  %1526 = vmatmul.msk.f32.gmra.mxu0 %vm103_vm0, %v74_v50  ;;  %1534 = vmatmul.msk.f32.gmra.mxu1 %vm103_vm0, %v74_v50 }
  0xc6   :  { %1614 = vpow2.f32 %v1541_v51  ;;  %v340_v51 = vld [vmem:[#allocation5] sm:$0xff] }
  0xcc   :  { %v1615_v53 = vpop.eup %1614 }
  0xcd   :  { %v298_v54 = vadd.f32 1.0, %v1615_v53  ;;  %v346_v53 = vsub.f32 1.0, %v340_v51 }
  0xcf   :  { %1616 = vrcp.f32 %v298_v54  ;;  %v311_v63 = vand.u32 2147483648, %v298_v54  ;;  %v309_v1 = vand.u32 2147483647, %v298_v54  ;;  %vm305_vm2 = vweird.f32 %v298_v54 }
  0xd0   :  { %1618 = vtanh.f32 %v291_v60 }
  0xd1   :  { %v312_v4 = vor.u32 1.1754944e-38, %v311_v63  ;;  %vm310_vm4 = vcmp.eq.f32.partialorder %v309_v1, 8.507059e+37  ;;  %1620 = vpow2.f32 %v1542_v8 }
  0xd5   :  { %v1617_v59 = vpop.eup %1616 }
  0xd6   :  { %v301_v61 = vmul.f32 %v1617_v59, %v298_v54  ;;  %vm306_vm1 = vweird.f32 %v1617_v59  ;;  %v1619_v3 = vpop.eup %1618  ;;  %v347_v54 = vmul.f32 0.0, %v346_v53 }
  0xd7   :  { %vm307_vm3 = vmor %vm305_vm2, %vm306_vm1  ;;  %v1621_v9 = vpop.eup %1620 }
  0xd8   :  { %v302_v62 = vsub.f32 1.0, %v301_v61  ;;  %v299_v10 = vadd.f32 1.0, %v1621_v9 }
  0xda   :  { %v303_v0 = vmul.f32 %v1617_v59, %v302_v62  ;;  %1622 = vrcp.f32 %v299_v10  ;;  %vm320_vm5 = vweird.f32 %v299_v10  ;;  %v326_v25 = vand.u32 2147483648, %v299_v10 }
  0xdb   :  { %v324_v36 = vand.u32 2147483647, %v299_v10 }
  0xdc   :  { %v304_v2 = vadd.f32 %v1617_v59, %v303_v0  ;;  %v327_v37 = vor.u32 1.1754944e-38, %v326_v25 }
  0xdd   :  { %vm325_vm8 = vcmp.eq.f32.partialorder %v324_v36, 8.507059e+37 }
  0xde   :  { %v308_v5 = vsel %vm307_vm3, %v1617_v59, %v304_v2 }
  0xdf   :  { %v313_v6 = vsel %vm310_vm4, %v312_v4, %v308_v5 }
  0xe0   :  { %v332_v7 = vmul.f32 %v1619_v3, %v313_v6  ;;  %v1623_v11 = vpop.eup %1622  ;;  %v331_v15 = vmul.f32 0.0, %v313_v6 }
  0xe1   :  { %v316_v12 = vmul.f32 %v1623_v11, %v299_v10  ;;  %vm321_vm6 = vweird.f32 %v1623_v11 }
  0xe2   :  { %334 = vrot.lane.b32.xlu0 %v332_v7, %s1826_s4  ;;  %vm322_vm7 = vmor %vm320_vm5, %vm321_vm6 }
  0xe3   :  { %v317_v13 = vsub.f32 1.0, %v316_v12 }
  0xe5   :  { %v318_v14 = vmul.f32 %v1623_v11, %v317_v13 }
  0xe7   :  { %v319_v34 = vadd.f32 %v1623_v11, %v318_v14 }
  0xe9   :  { %v323_v43 = vsel %vm322_vm7, %v1623_v11, %v319_v34 }
  0xea   :  { %v328_v48 = vsel %vm325_vm8, %v327_v37, %v323_v43 }
 0x142   :  { %v148_v62 = vpop.f32.mrf.mxu0  ;;  %v189_v5 = vpop.f32.mrf.mxu1 }
 0x143   :  { %v149_v63 = vadd.f32 %v148_v62, %v2029_v46  ;;  %v190_v6 = vadd.f32 %v189_v5, %v2036_v56  ;;  %v75_v5 = vld [vmem:[%s2383_s0 + $0x10] sm:$0xff] }
 0x144   :  { %1527 = vmatmul.msk.f32.gmra.mxu0 %vm103_vm0, %v75_v5  ;;  %1535 = vmatmul.msk.f32.gmra.mxu1 %vm103_vm0, %v75_v5 }
 0x154   :  { %v335_v16 = vpop.permute.xlu0 %334 }
 0x155   :  { %v337_v20 = vadd.f32 %v335_v16, %v331_v15 }
 0x157   :  { %1624 = vtanh.f32 %v337_v20  ;;  %350 = vrot.lane.b32.xlu1 %v337_v20, %s1826_s4 }
 0x15d   :  { %v1625_v45 = vpop.eup %1624 }
 0x15e   :  { %v339_v49 = vmul.f32 %v1625_v45, %v328_v48 }
 0x160   :  { %342 = vrot.lane.b32.xlu0 %v339_v49, %s1826_s4 }
 0x1c9   :  { %v351_v55 = vpop.permute.xlu1 %350 }
 0x1ca   :  { %v353_v57 = vmul.f32 %v351_v55, %v340_v51 }
 0x1cc   :  { %v2047_v58 = vadd.f32 %v353_v57, %v347_v54 }
 0x1ce   :  { %453 = vrot.lane.b32.xlu1 %v2047_v58, %s1826_s4 }
 0x1d2   :  { %v343_v59 = vpop.permute.xlu0 %342 }
 0x1d3   :  { %v2051_v60 = vmul.f32 %v343_v59, %v340_v51 }
 0x1d5   :  { %v2054_v61 = vadd.f32 %v347_v54, %v2051_v60  ;;  %356 = vst.msk [vmem:[#allocation3] sm:$0xff] %vm355_vm9, %v2051_v60 }
 0x1d7   :  { %1543 = vmatmul.msk.f32.vlgmr.msra.gmra.mxu2 %vm103_vm0, %v2054_v61  ;;  %1544 = vmatmul.msk.f32.vlgmr.msra.gmra.mxu3 %vm103_vm0, %v2054_v61 }
 0x1d8   :  { %633 = vmatpush.msra.mxu2 %v1880_v17  ;;  %653 = vmatpush.msra.mxu3 %v1882_v18 }
 0x1da   :  { %634 = vmatpush.msra.mxu2 %v1885_v19  ;;  %654 = vmatpush.msra.mxu3 %v1892_v21 }
 0x1dc   :  { %635 = vmatpush.msra.mxu2 %v1894_v22  ;;  %655 = vmatpush.msra.mxu3 %v1899_v23 }
 0x1de   :  { %636 = vmatpush.msra.mxu2 %v1901_v24  ;;  %656 = vmatpush.msra.mxu3 %v1909_v26 }
 0x1e0   :  { %637 = vmatpush.msra.mxu2 %v1912_v27  ;;  %657 = vmatpush.msra.mxu3 %v1917_v28 }
 0x1e2   :  { %638 = vmatpush.msra.mxu2 %v1921_v29  ;;  %658 = vmatpush.msra.mxu3 %v1926_v30 }
 0x1e4   :  { %639 = vmatpush.msra.mxu2 %v1928_v31  ;;  %659 = vmatpush.msra.mxu3 %v1933_v32 }
 0x1e6   :  { %640 = vmatpush.msra.mxu2 %v1936_v33  ;;  %660 = vmatpush.msra.mxu3 %v1944_v35 }
 0x240   :  { %v454_v51 = vpop.permute.xlu1 %453 }
 0x25a   :  { %v388_v0 = vpop.f32.mrf.mxu2  ;;  %v408_v7 = vpop.f32.mrf.mxu3 }
 0x25b   :  { %v411_v1 = vadd.f32 %v388_v0, %v149_v63  ;;  %v412_v9 = vadd.f32 %v408_v7, %v190_v6  ;;  %v466_v6 = vld [vmem:[#allocation5 + $0x8] sm:$0xff] }
 0x25c   :  { %v472_v7 = vsub.f32 1.0, %v466_v6 }
 0x25d   :  { %v1545_v2 = vmul.f32 -1.442695, %v411_v1  ;;  %v1546_v37 = vmul.f32 -1.442695, %v412_v9 }
 0x25f   :  { %1626 = vpow2.f32 %v1545_v2 }
 0x265   :  { %v1627_v3 = vpop.eup %1626 }
 0x266   :  { %v419_v4 = vadd.f32 1.0, %v1627_v3 }
 0x268   :  { %1628 = vrcp.f32 %v419_v4  ;;  %v432_v12 = vand.u32 2147483648, %v419_v4  ;;  %v430_v14 = vand.u32 2147483647, %v419_v4  ;;  %vm426_vm11 = vweird.f32 %v419_v4 }
 0x269   :  { %1630 = vtanh.f32 %v412_v9  ;;  %v473_v9 = vmul.f32 %v472_v7, %v2054_v61 }
 0x26a   :  { %v433_v16 = vor.u32 1.1754944e-38, %v432_v12  ;;  %vm431_vm13 = vcmp.eq.f32.partialorder %v430_v14, 8.507059e+37  ;;  %1632 = vpow2.f32 %v1546_v37  ;;  %v480_v12 = vmul.f32 %v472_v7, %v2047_v58  ;;  %v192_v37 = vpop.f32.mrf.mxu1 }
 0x26e   :  { %v1629_v8 = vpop.eup %1628 }
 0x26f   :  { %v422_v10 = vmul.f32 %v1629_v8, %v419_v4  ;;  %vm427_vm10 = vweird.f32 %v1629_v8  ;;  %v1631_v25 = vpop.eup %1630 }
 0x270   :  { %vm428_vm12 = vmor %vm426_vm11, %vm427_vm10  ;;  %v1633_v43 = vpop.eup %1632 }
 0x271   :  { %v423_v11 = vsub.f32 1.0, %v422_v10  ;;  %v420_v45 = vadd.f32 1.0, %v1633_v43  ;;  %v193_v43 = vadd.f32 %v192_v37, %v2036_v56 }
 0x273   :  { %v424_v13 = vmul.f32 %v1629_v8, %v423_v11  ;;  %1634 = vrcp.f32 %v420_v45  ;;  %v447_v62 = vand.u32 2147483648, %v420_v45  ;;  %vm441_vm15 = vweird.f32 %v420_v45 }
 0x274   :  { %v445_v63 = vand.u32 2147483647, %v420_v45 }
 0x275   :  { %v425_v15 = vadd.f32 %v1629_v8, %v424_v13  ;;  %v448_v1 = vor.u32 1.1754944e-38, %v447_v62 }
 0x276   :  { %vm446_vm2 = vcmp.eq.f32.partialorder %v445_v63, 8.507059e+37 }
 0x277   :  { %v429_v20 = vsel %vm428_vm12, %v1629_v8, %v425_v15  ;;  %v151_v15 = vpop.f32.mrf.mxu0 }
 0x278   :  { %v434_v34 = vsel %vm431_vm13, %v433_v16, %v429_v20  ;;  %v152_v58 = vadd.f32 %v151_v15, %v2029_v46 }
 0x279   :  { %v457_v36 = vmul.f32 %v1631_v25, %v434_v34  ;;  %v1635_v48 = vpop.eup %1634  ;;  %v456_v54 = vmul.f32 %v454_v51, %v434_v34 }
 0x27a   :  { %v437_v49 = vmul.f32 %v1635_v48, %v420_v45  ;;  %vm442_vm14 = vweird.f32 %v1635_v48 }
 0x27b   :  { %459 = vrot.lane.b32.xlu2 %v457_v36, %s1826_s4  ;;  %vm443_vm1 = vmor %vm441_vm15, %vm442_vm14 }
 0x27c   :  { %v438_v50 = vsub.f32 1.0, %v437_v49 }
 0x27e   :  { %v439_v53 = vmul.f32 %v1635_v48, %v438_v50 }
 0x280   :  { %v440_v59 = vadd.f32 %v1635_v48, %v439_v53 }
 0x282   :  { %v444_v0 = vsel %vm443_vm1, %v1635_v48, %v440_v59 }
 0x283   :  { %v449_v3 = vsel %vm446_vm2, %v448_v1, %v444_v0 }
 0x2d5   :  { %v460_v55 = vpop.permute.xlu2 %459 }
 0x2d6   :  { %v462_v57 = vadd.f32 %v460_v55, %v456_v54 }
 0x2d8   :  { %1636 = vtanh.f32 %v462_v57  ;;  %476 = vrot.lane.b32.xlu0 %v462_v57, %s1826_s4 }
 0x2de   :  { %v1637_v2 = vpop.eup %1636 }
 0x2df   :  { %v464_v4 = vmul.f32 %v1637_v2, %v449_v3 }
 0x2e1   :  { %468 = vrot.lane.b32.xlu2 %v464_v4, %s1826_s4 }
 0x33b   :  { %v469_v8 = vpop.permute.xlu2 %468 }
 0x33c   :  { %v2089_v10 = vmul.f32 %v469_v8, %v466_v6 }
 0x33e   :  { %v2092_v11 = vadd.f32 %v473_v9, %v2089_v10  ;;  %483 = vst.msk [vmem:[#allocation3 + $0x8] sm:$0xff] %vm355_vm9, %v2089_v10 }
 0x340   :  { %1547 = vmatmul.msk.f32.vlgmr.msrb.gmra.mxu2 %vm103_vm0, %v2092_v11  ;;  %1548 = vmatmul.msk.f32.vlgmr.msrb.gmra.mxu3 %vm103_vm0, %v2092_v11 }
 0x341   :  { %887 = vmatpush.msrb.mxu2 %v1880_v17  ;;  %907 = vmatpush.msrb.mxu3 %v1882_v18 }
 0x343   :  { %888 = vmatpush.msrb.mxu2 %v1885_v19  ;;  %908 = vmatpush.msrb.mxu3 %v1892_v21 }
 0x345   :  { %889 = vmatpush.msrb.mxu2 %v1894_v22  ;;  %909 = vmatpush.msrb.mxu3 %v1899_v23 }
 0x347   :  { %890 = vmatpush.msrb.mxu2 %v1901_v24  ;;  %910 = vmatpush.msrb.mxu3 %v1909_v26 }
 0x349   :  { %891 = vmatpush.msrb.mxu2 %v1912_v27  ;;  %911 = vmatpush.msrb.mxu3 %v1917_v28 }
 0x34a   :  { %v477_v61 = vpop.permute.xlu0 %476 }
 0x34b   :  { %v479_v13 = vmul.f32 %v477_v61, %v466_v6  ;;  %892 = vmatpush.msrb.mxu2 %v1921_v29  ;;  %912 = vmatpush.msrb.mxu3 %v1926_v30 }
 0x34d   :  { %v2113_v14 = vadd.f32 %v480_v12, %v479_v13  ;;  %893 = vmatpush.msrb.mxu2 %v1928_v31  ;;  %913 = vmatpush.msrb.mxu3 %v1933_v32 }
 0x34f   :  { %580 = vrot.lane.b32.xlu1 %v2113_v14, %s1826_s4  ;;  %894 = vmatpush.msrb.mxu2 %v1936_v33 }
 0x350   :  { %914 = vmatpush.msrb.mxu3 %v1944_v35 }
 0x3c1   :  { %v581_v8 = vpop.permute.xlu1 %580 }
 0x3c3   :  { %v515_v16 = vpop.f32.mrf.mxu2  ;;  %v535_v45 = vpop.f32.mrf.mxu3 }
 0x3c4   :  { %v538_v20 = vadd.f32 %v515_v16, %v152_v58  ;;  %v539_v49 = vadd.f32 %v535_v45, %v193_v43  ;;  %v76_v43 = vld [vmem:[%s2383_s0 + $0x18] sm:$0xff]  ;;  %v593_v45 = vld [vmem:[#allocation5 + $0x10] sm:$0xff] }
 0x3c5   :  { %1528 = vmatmul.msk.f32.gmra.mxu0 %vm103_vm0, %v76_v43  ;;  %1536 = vmatmul.msk.f32.gmra.mxu1 %vm103_vm0, %v76_v43 }
 0x3c6   :  { %v1549_v25 = vmul.f32 -1.442695, %v538_v20  ;;  %v1550_v2 = vmul.f32 -1.442695, %v539_v49 }
 0x3c8   :  { %1638 = vpow2.f32 %v1549_v25 }
 0x3ce   :  { %v1639_v34 = vpop.eup %1638 }
 0x3cf   :  { %v546_v36 = vadd.f32 1.0, %v1639_v34 }
 0x3d1   :  { %1640 = vrcp.f32 %v546_v36  ;;  %v559_v53 = vand.u32 2147483648, %v546_v36  ;;  %v557_v55 = vand.u32 2147483647, %v546_v36  ;;  %vm553_vm4 = vweird.f32 %v546_v36 }
 0x3d2   :  { %1642 = vtanh.f32 %v539_v49 }
 0x3d3   :  { %v560_v59 = vor.u32 1.1754944e-38, %v559_v53  ;;  %vm558_vm6 = vcmp.eq.f32.partialorder %v557_v55, 8.507059e+37  ;;  %1644 = vpow2.f32 %v1550_v2 }
 0x3d7   :  { %v1641_v48 = vpop.eup %1640 }
 0x3d8   :  { %v549_v50 = vmul.f32 %v1641_v48, %v546_v36  ;;  %vm554_vm3 = vweird.f32 %v1641_v48  ;;  %v1643_v63 = vpop.eup %1642 }
 0x3d9   :  { %vm555_vm5 = vmor %vm553_vm4, %vm554_vm3  ;;  %v1645_v3 = vpop.eup %1644 }
 0x3da   :  { %v550_v51 = vsub.f32 1.0, %v549_v50  ;;  %v547_v4 = vadd.f32 1.0, %v1645_v3 }
 0x3dc   :  { %v551_v54 = vmul.f32 %v1641_v48, %v550_v51  ;;  %1646 = vrcp.f32 %v547_v4  ;;  %v574_v58 = vand.u32 2147483648, %v547_v4  ;;  %vm568_vm8 = vweird.f32 %v547_v4 }
 0x3dd   :  { %v572_v16 = vand.u32 2147483647, %v547_v4 }
 0x3de   :  { %v552_v57 = vadd.f32 %v1641_v48, %v551_v54  ;;  %v575_v25 = vor.u32 1.1754944e-38, %v574_v58 }
 0x3df   :  { %vm573_vm11 = vcmp.eq.f32.partialorder %v572_v16, 8.507059e+37 }
 0x3e0   :  { %v556_v62 = vsel %vm555_vm5, %v1641_v48, %v552_v57  ;;  %v599_v48 = vsub.f32 1.0, %v593_v45 }
 0x3e1   :  { %v561_v0 = vsel %vm558_vm6, %v560_v59, %v556_v62 }
 0x3e2   :  { %v584_v1 = vmul.f32 %v1643_v63, %v561_v0  ;;  %v1647_v5 = vpop.eup %1646  ;;  %v583_v61 = vmul.f32 %v581_v8, %v561_v0  ;;  %v607_v50 = vmul.f32 %v599_v48, %v2113_v14  ;;  %v600_v55 = vmul.f32 %v599_v48, %v2092_v11 }
 0x3e3   :  { %v564_v6 = vmul.f32 %v1647_v5, %v547_v4  ;;  %vm569_vm7 = vweird.f32 %v1647_v5 }
 0x3e4   :  { %586 = vrot.lane.b32.xlu2 %v584_v1, %s1826_s4  ;;  %vm570_vm10 = vmor %vm568_vm8, %vm569_vm7 }
 0x3e5   :  { %v565_v7 = vsub.f32 1.0, %v564_v6 }
 0x3e7   :  { %v566_v9 = vmul.f32 %v1647_v5, %v565_v7 }
 0x3e9   :  { %v567_v15 = vadd.f32 %v1647_v5, %v566_v9 }
 0x3eb   :  { %v571_v20 = vsel %vm570_vm10, %v1647_v5, %v567_v15 }
 0x3ec   :  { %v576_v36 = vsel %vm573_vm11, %v575_v25, %v571_v20 }
 0x43e   :  { %v587_v12 = vpop.permute.xlu2 %586 }
 0x43f   :  { %v589_v13 = vadd.f32 %v587_v12, %v583_v61 }
 0x441   :  { %1648 = vtanh.f32 %v589_v13  ;;  %603 = vrot.lane.b32.xlu1 %v589_v13, %s1826_s4 }
 0x447   :  { %v1649_v34 = vpop.eup %1648 }
 0x448   :  { %v591_v37 = vmul.f32 %v1649_v34, %v576_v36 }
 0x44a   :  { %595 = vrot.lane.b32.xlu0 %v591_v37, %s1826_s4 }
 0x4b3   :  { %v604_v49 = vpop.permute.xlu1 %603 }
 0x4b4   :  { %v606_v51 = vmul.f32 %v604_v49, %v593_v45 }
 0x4b6   :  { %v2132_v53 = vadd.f32 %v607_v50, %v606_v51 }
 0x4b8   :  { %707 = vrot.lane.b32.xlu2 %v2132_v53, %s1826_s4 }
 0x4bc   :  { %v596_v54 = vpop.permute.xlu0 %595 }
 0x4bd   :  { %v2137_v57 = vmul.f32 %v596_v54, %v593_v45  ;;  %v720_v45 = vld [vmem:[#allocation5 + $0x18] sm:$0xff] }
 0x4be   :  { %v726_v48 = vsub.f32 1.0, %v720_v45 }
 0x4bf   :  { %v2140_v59 = vadd.f32 %v600_v55, %v2137_v57  ;;  %610 = vst.msk [vmem:[#allocation3 + $0x10] sm:$0xff] %vm355_vm9, %v2137_v57 }
 0x4c0   :  { %v734_v50 = vmul.f32 %v726_v48, %v2132_v53  ;;  %v158_v53 = vadd.f32 %v2014_v38, %v2029_v46 }
 0x4c1   :  { %1551 = vmatmul.msk.f32.vlgmr.msra.gmra.mxu2 %vm103_vm0, %v2140_v59  ;;  %1552 = vmatmul.msk.f32.vlgmr.msra.gmra.mxu3 %vm103_vm0, %v2140_v59 }
 0x4c2   :  { %1141 = vmatpush.msra.mxu2 %v1880_v17  ;;  %1161 = vmatpush.msra.mxu3 %v1882_v18  ;;  %v154_v17 = vpop.f32.mrf.mxu0 }
 0x4c3   :  { %v155_v18 = vadd.f32 %v154_v17, %v2029_v46  ;;  %v727_v17 = vmul.f32 %v726_v48, %v2140_v59 }
 0x4c4   :  { %1142 = vmatpush.msra.mxu2 %v1885_v19  ;;  %1162 = vmatpush.msra.mxu3 %v1892_v21 }
 0x4c6   :  { %1143 = vmatpush.msra.mxu2 %v1894_v22  ;;  %1163 = vmatpush.msra.mxu3 %v1899_v23 }
 0x4c8   :  { %1144 = vmatpush.msra.mxu2 %v1901_v24  ;;  %1164 = vmatpush.msra.mxu3 %v1909_v26  ;;  %v195_v26 = vpop.f32.mrf.mxu1 }
 0x4ca   :  { %1145 = vmatpush.msra.mxu2 %v1912_v27  ;;  %1165 = vmatpush.msra.mxu3 %v1917_v28  ;;  %v196_v27 = vadd.f32 %v195_v26, %v2036_v56 }
 0x4cc   :  { %1146 = vmatpush.msra.mxu2 %v1921_v29  ;;  %1166 = vmatpush.msra.mxu3 %v1926_v30 }
 0x4ce   :  { %1147 = vmatpush.msra.mxu2 %v1928_v31  ;;  %1167 = vmatpush.msra.mxu3 %v1933_v32 }
 0x4d0   :  { %1148 = vmatpush.msra.mxu2 %v1936_v33  ;;  %1168 = vmatpush.msra.mxu3 %v1944_v35 }
 0x512   :  { %v708_v9 = vpop.permute.xlu2 %707 }
 0x544   :  { %v642_v19 = vpop.f32.mrf.mxu2  ;;  %v662_v28 = vpop.f32.mrf.mxu3 }
 0x545   :  { %v665_v21 = vadd.f32 %v642_v19, %v155_v18  ;;  %v666_v30 = vadd.f32 %v662_v28, %v196_v27  ;;  %v199_v27 = vadd.f32 %v2018_v40, %v2036_v56 }
 0x547   :  { %v1553_v22 = vmul.f32 -1.442695, %v665_v21  ;;  %v1554_v3 = vmul.f32 -1.442695, %v666_v30 }
 0x549   :  { %1650 = vpow2.f32 %v1553_v22 }
 0x54f   :  { %v1651_v23 = vpop.eup %1650 }
 0x550   :  { %v673_v24 = vadd.f32 1.0, %v1651_v23 }
 0x552   :  { %1652 = vrcp.f32 %v673_v24  ;;  %v686_v33 = vand.u32 2147483648, %v673_v24  ;;  %v684_v11 = vand.u32 2147483647, %v673_v24  ;;  %vm680_vm13 = vweird.f32 %v673_v24 }
 0x553   :  { %1654 = vtanh.f32 %v666_v30 }
 0x554   :  { %v687_v62 = vor.u32 1.1754944e-38, %v686_v33  ;;  %vm685_vm15 = vcmp.eq.f32.partialorder %v684_v11, 8.507059e+37  ;;  %1656 = vpow2.f32 %v1554_v3 }
 0x558   :  { %v1653_v29 = vpop.eup %1652 }
 0x559   :  { %v676_v31 = vmul.f32 %v1653_v29, %v673_v24  ;;  %vm681_vm12 = vweird.f32 %v1653_v29  ;;  %v1655_v0 = vpop.eup %1654 }
 0x55a   :  { %vm682_vm14 = vmor %vm680_vm13, %vm681_vm12  ;;  %v1657_v4 = vpop.eup %1656 }
 0x55b   :  { %v677_v32 = vsub.f32 1.0, %v676_v31  ;;  %v674_v5 = vadd.f32 1.0, %v1657_v4 }
 0x55d   :  { %v678_v35 = vmul.f32 %v1653_v29, %v677_v32  ;;  %1658 = vrcp.f32 %v674_v5  ;;  %v701_v16 = vand.u32 2147483648, %v674_v5  ;;  %vm695_vm2 = vweird.f32 %v674_v5 }
 0x55e   :  { %v699_v20 = vand.u32 2147483647, %v674_v5 }
 0x55f   :  { %v679_v14 = vadd.f32 %v1653_v29, %v678_v35  ;;  %v702_v34 = vor.u32 1.1754944e-38, %v701_v16 }
 0x560   :  { %vm700_vm4 = vcmp.eq.f32.partialorder %v699_v20, 8.507059e+37 }
 0x561   :  { %v683_v63 = vsel %vm682_vm14, %v1653_v29, %v679_v14 }
 0x562   :  { %v688_v1 = vsel %vm685_vm15, %v687_v62, %v683_v63 }
 0x563   :  { %v711_v2 = vmul.f32 %v1655_v0, %v688_v1  ;;  %v1659_v6 = vpop.eup %1658  ;;  %v710_v12 = vmul.f32 %v708_v9, %v688_v1 }
 0x564   :  { %v691_v7 = vmul.f32 %v1659_v6, %v674_v5  ;;  %vm696_vm1 = vweird.f32 %v1659_v6 }
 0x565   :  { %713 = vrot.lane.b32.xlu0 %v711_v2, %s1826_s4  ;;  %vm697_vm3 = vmor %vm695_vm2, %vm696_vm1 }
 0x566   :  { %v692_v8 = vsub.f32 1.0, %v691_v7 }
 0x568   :  { %v693_v61 = vmul.f32 %v1659_v6, %v692_v8 }
 0x56a   :  { %v694_v58 = vadd.f32 %v1659_v6, %v693_v61 }
 0x56c   :  { %v698_v25 = vsel %vm697_vm3, %v1659_v6, %v694_v58 }
 0x56d   :  { %v703_v37 = vsel %vm700_vm4, %v702_v34, %v698_v25 }
 0x5d7   :  { %v714_v13 = vpop.permute.xlu0 %713 }
 0x5d8   :  { %v716_v15 = vadd.f32 %v714_v13, %v710_v12 }
 0x5da   :  { %1660 = vtanh.f32 %v716_v15  ;;  %730 = vrot.lane.b32.xlu2 %v716_v15, %s1826_s4 }
 0x5e0   :  { %v1661_v36 = vpop.eup %1660 }
 0x5e1   :  { %v718_v43 = vmul.f32 %v1661_v36, %v703_v37  ;;  %v847_v36 = vld [vmem:[#allocation5 + $0x20] sm:$0xff] }
 0x5e2   :  { %v853_v37 = vsub.f32 1.0, %v847_v36 }
 0x5e3   :  { %722 = vrot.lane.b32.xlu1 %v718_v43, %s1826_s4 }
 0x634   :  { %v731_v49 = vpop.permute.xlu2 %730 }
 0x635   :  { %v733_v51 = vmul.f32 %v731_v49, %v720_v45 }
 0x637   :  { %v2170_v54 = vadd.f32 %v734_v50, %v733_v51 }
 0x639   :  { %834 = vrot.lane.b32.xlu0 %v2170_v54, %s1826_s4  ;;  %v861_v51 = vmul.f32 %v853_v37, %v2170_v54  ;;  %v202_v54 = vadd.f32 %v2022_v42, %v2036_v56 }
 0x655   :  { %v723_v55 = vpop.permute.xlu1 %722 }
 0x656   :  { %v2175_v18 = vmul.f32 %v723_v55, %v720_v45 }
 0x658   :  { %v2178_v19 = vadd.f32 %v727_v17, %v2175_v18  ;;  %737 = vst.msk [vmem:[#allocation3 + $0x18] sm:$0xff] %vm355_vm9, %v2175_v18 }
 0x65a   :  { %1555 = vmatmul.msk.f32.vlgmr.msrb.gmra.mxu0 %vm103_vm0, %v2178_v19  ;;  %1556 = vmatmul.msk.f32.vlgmr.msrb.gmra.mxu1 %vm103_vm0, %v2178_v19  ;;  %v854_v45 = vmul.f32 %v853_v37, %v2178_v19  ;;  %v161_v19 = vadd.f32 %v2016_v39, %v2029_v46 }
 0x6ab   :  { %v835_v6 = vpop.permute.xlu0 %834 }
 0x6d7   :  { %v769_v21 = vpop.f32.mrf.mxu0  ;;  %v789_v26 = vpop.f32.mrf.mxu1 }
 0x6d8   :  { %v792_v22 = vadd.f32 %v769_v21, %v158_v53  ;;  %v793_v29 = vadd.f32 %v789_v26, %v199_v27 }
 0x6da   :  { %v1557_v59 = vmul.f32 -1.442695, %v792_v22  ;;  %v1558_v40 = vmul.f32 -1.442695, %v793_v29 }
 0x6dc   :  { %1662 = vpow2.f32 %v1557_v59 }
 0x6e2   :  { %v1663_v23 = vpop.eup %1662 }
 0x6e3   :  { %v800_v24 = vadd.f32 1.0, %v1663_v23 }
 0x6e5   :  { %1664 = vrcp.f32 %v800_v24  ;;  %v813_v32 = vand.u32 2147483648, %v800_v24  ;;  %v811_v38 = vand.u32 2147483647, %v800_v24  ;;  %vm807_vm6 = vweird.f32 %v800_v24 }
 0x6e6   :  { %1666 = vtanh.f32 %v793_v29 }
 0x6e7   :  { %v814_v11 = vor.u32 1.1754944e-38, %v813_v32  ;;  %vm812_vm8 = vcmp.eq.f32.partialorder %v811_v38, 8.507059e+37  ;;  %1668 = vpow2.f32 %v1558_v40 }
 0x6eb   :  { %v1665_v28 = vpop.eup %1664 }
 0x6ec   :  { %v803_v30 = vmul.f32 %v1665_v28, %v800_v24  ;;  %vm808_vm5 = vweird.f32 %v1665_v28  ;;  %v1667_v62 = vpop.eup %1666 }
 0x6ed   :  { %vm809_vm7 = vmor %vm807_vm6, %vm808_vm5  ;;  %v1669_v1 = vpop.eup %1668 }
 0x6ee   :  { %v804_v31 = vsub.f32 1.0, %v803_v30  ;;  %v801_v2 = vadd.f32 1.0, %v1669_v1 }
 0x6f0   :  { %v805_v33 = vmul.f32 %v1665_v28, %v804_v31  ;;  %1670 = vrcp.f32 %v801_v2  ;;  %v828_v13 = vand.u32 2147483648, %v801_v2  ;;  %vm822_vm11 = vweird.f32 %v801_v2 }
 0x6f1   :  { %v826_v15 = vand.u32 2147483647, %v801_v2 }
 0x6f2   :  { %v806_v35 = vadd.f32 %v1665_v28, %v805_v33  ;;  %v829_v16 = vor.u32 1.1754944e-38, %v828_v13 }
 0x6f3   :  { %vm827_vm13 = vcmp.eq.f32.partialorder %v826_v15, 8.507059e+37 }
 0x6f4   :  { %v810_v14 = vsel %vm809_vm7, %v1665_v28, %v806_v35 }
 0x6f5   :  { %v815_v63 = vsel %vm812_vm8, %v814_v11, %v810_v14 }
 0x6f6   :  { %v838_v0 = vmul.f32 %v1667_v62, %v815_v63  ;;  %v1671_v3 = vpop.eup %1670  ;;  %v837_v8 = vmul.f32 %v835_v6, %v815_v63 }
 0x6f7   :  { %v818_v4 = vmul.f32 %v1671_v3, %v801_v2  ;;  %vm823_vm10 = vweird.f32 %v1671_v3 }
 0x6f8   :  { %840 = vrot.lane.b32.xlu1 %v838_v0, %s1826_s4  ;;  %vm824_vm12 = vmor %vm822_vm11, %vm823_vm10 }
 0x6f9   :  { %v819_v5 = vsub.f32 1.0, %v818_v4 }
 0x6fb   :  { %v820_v7 = vmul.f32 %v1671_v3, %v819_v5 }
 0x6fd   :  { %v821_v12 = vadd.f32 %v1671_v3, %v820_v7 }
 0x6ff   :  { %v825_v58 = vsel %vm824_vm12, %v1671_v3, %v821_v12 }
 0x700   :  { %v830_v25 = vsel %vm827_vm13, %v829_v16, %v825_v58  ;;  %v1252_v16 = vld [vmem:[%s2388_s5 + $0x18] sm:$0xff] }
 0x701   :  { %1366 = vmatpush.msrb.mxu1 %v1252_v16 }
 0x76a   :  { %v841_v9 = vpop.permute.xlu1 %840 }
 0x76b   :  { %v843_v61 = vadd.f32 %v841_v9, %v837_v8 }
 0x76d   :  { %1672 = vtanh.f32 %v843_v61  ;;  %857 = vrot.lane.b32.xlu0 %v843_v61, %s1826_s4 }
 0x773   :  { %v1673_v20 = vpop.eup %1672 }
 0x774   :  { %v845_v34 = vmul.f32 %v1673_v20, %v830_v25  ;;  %v1251_v20 = vld [vmem:[%s2388_s5 + $0x10] sm:$0xff]  ;;  %v1250_v25 = vld [vmem:[%s2388_s5 + $0x8] sm:$0xff] }
 0x775   :  { %1367 = vmatpush.msrb.mxu1 %v1251_v20 }
 0x776   :  { %849 = vrot.lane.b32.xlu2 %v845_v34, %s1826_s4  ;;  %v1249_v34 = vld [vmem:[%s2388_s5] sm:$0xff] }
 0x777   :  { %1368 = vmatpush.msrb.mxu1 %v1250_v25 }
 0x779   :  { %1369 = vmatpush.msrb.mxu1 %v1249_v34 }
 0x7d0   :  { %v850_v43 = vpop.permute.xlu2 %849 }
 0x7d1   :  { %v2194_v48 = vmul.f32 %v850_v43, %v847_v36 }
 0x7d3   :  { %v2197_v49 = vadd.f32 %v854_v45, %v2194_v48  ;;  %864 = vst.msk [vmem:[#allocation3 + $0x20] sm:$0xff] %vm355_vm9, %v2194_v48 }
 0x7d5   :  { %1559 = vmatmul.msk.f32.vlgmr.msrb.gmra.mxu2 %vm103_vm0, %v2197_v49  ;;  %1560 = vmatmul.msk.f32.vlgmr.msrb.gmra.mxu3 %vm103_vm0, %v2197_v49 }
 0x7df   :  { %v858_v50 = vpop.permute.xlu0 %857 }
 0x7e0   :  { %v860_v55 = vmul.f32 %v858_v50, %v847_v36  ;;  %v974_v36 = vld [vmem:[#allocation5 + $0x28] sm:$0xff] }
 0x7e1   :  { %v980_v37 = vsub.f32 1.0, %v974_v36 }
 0x7e2   :  { %v2206_v17 = vadd.f32 %v861_v51, %v860_v55 }
 0x7e4   :  { %961 = vrot.lane.b32.xlu1 %v2206_v17, %s1826_s4  ;;  %v988_v45 = vmul.f32 %v980_v37, %v2206_v17  ;;  %v1241_v17 = vld [vmem:[#allocation3] sm:$0xff] }
 0x856   :  { %v962_v2 = vpop.permute.xlu1 %961 }
 0x858   :  { %v896_v53 = vpop.f32.mrf.mxu2  ;;  %v916_v24 = vpop.f32.mrf.mxu3 }
 0x859   :  { %v919_v21 = vadd.f32 %v896_v53, %v161_v19  ;;  %v920_v27 = vadd.f32 %v916_v24, %v202_v54  ;;  %v981_v19 = vmul.f32 %v980_v37, %v2197_v49  ;;  %v1243_v49 = vld [vmem:[#allocation3 + $0x10] sm:$0xff]  ;;  %v164_v54 = vadd.f32 %v2020_v41, %v2029_v46 }
 0x85a   :  { %v1101_v37 = vld [vmem:[#allocation5 + $0x30] sm:$0xff] }
 0x85b   :  { %v1561_v22 = vmul.f32 -1.442695, %v919_v21  ;;  %v1562_v42 = vmul.f32 -1.442695, %v920_v27 }
 0x85d   :  { %1674 = vpow2.f32 %v1561_v22  ;;  %v1242_v22 = vld [vmem:[#allocation3 + $0x8] sm:$0xff] }
 0x863   :  { %v1675_v59 = vpop.eup %1674 }
 0x864   :  { %v927_v23 = vadd.f32 1.0, %v1675_v59  ;;  %v1244_v59 = vld [vmem:[#allocation3 + $0x18] sm:$0xff] }
 0x866   :  { %1676 = vrcp.f32 %v927_v23  ;;  %v940_v30 = vand.u32 2147483648, %v927_v23  ;;  %v938_v39 = vand.u32 2147483647, %v927_v23  ;;  %vm934_vm15 = vweird.f32 %v927_v23 }
 0x867   :  { %1678 = vtanh.f32 %v920_v27 }
 0x868   :  { %v941_v33 = vor.u32 1.1754944e-38, %v940_v30  ;;  %vm939_vm2 = vcmp.eq.f32.partialorder %v938_v39, 8.507059e+37  ;;  %1680 = vpow2.f32 %v1562_v42  ;;  %v205_v39 = vadd.f32 %v2031_v47, %v2036_v56 }
 0x86c   :  { %v1677_v26 = vpop.eup %1676 }
 0x86d   :  { %v930_v28 = vmul.f32 %v1677_v26, %v927_v23  ;;  %vm935_vm14 = vweird.f32 %v1677_v26  ;;  %v1679_v35 = vpop.eup %1678  ;;  %v1245_v23 = vld [vmem:[#allocation3 + $0x20] sm:$0xff] }
 0x86e   :  { %vm936_vm1 = vmor %vm934_vm15, %vm935_vm14  ;;  %v1681_v62 = vpop.eup %1680 }
 0x86f   :  { %v931_v29 = vsub.f32 1.0, %v930_v28  ;;  %v928_v63 = vadd.f32 1.0, %v1681_v62 }
 0x871   :  { %v932_v31 = vmul.f32 %v1677_v26, %v931_v29  ;;  %1682 = vrcp.f32 %v928_v63  ;;  %v955_v8 = vand.u32 2147483648, %v928_v63  ;;  %vm949_vm4 = vweird.f32 %v928_v63 }
 0x872   :  { %v953_v9 = vand.u32 2147483647, %v928_v63 }
 0x873   :  { %v933_v32 = vadd.f32 %v1677_v26, %v932_v31  ;;  %v956_v12 = vor.u32 1.1754944e-38, %v955_v8 }
 0x874   :  { %vm954_vm6 = vcmp.eq.f32.partialorder %v953_v9, 8.507059e+37 }
 0x875   :  { %v937_v38 = vsel %vm936_vm1, %v1677_v26, %v933_v32 }
 0x876   :  { %v942_v11 = vsel %vm939_vm2, %v941_v33, %v937_v38 }
 0x877   :  { %v965_v14 = vmul.f32 %v1679_v35, %v942_v11  ;;  %v1683_v0 = vpop.eup %1682  ;;  %v964_v4 = vmul.f32 %v962_v2, %v942_v11 }
 0x878   :  { %v945_v40 = vmul.f32 %v1683_v0, %v928_v63  ;;  %vm950_vm3 = vweird.f32 %v1683_v0 }
 0x879   :  { %967 = vrot.lane.b32.xlu2 %v965_v14, %s1826_s4  ;;  %vm951_vm5 = vmor %vm949_vm4, %vm950_vm3 }
 0x87a   :  { %v946_v1 = vsub.f32 1.0, %v945_v40 }
 0x87c   :  { %v947_v3 = vmul.f32 %v1683_v0, %v946_v1 }
 0x87e   :  { %v948_v7 = vadd.f32 %v1683_v0, %v947_v3 }
 0x880   :  { %v952_v61 = vsel %vm951_vm5, %v1683_v0, %v948_v7 }
 0x881   :  { %v957_v15 = vsel %vm954_vm6, %v956_v12, %v952_v61 }
 0x8d3   :  { %v968_v5 = vpop.permute.xlu2 %967 }
 0x8d4   :  { %v970_v6 = vadd.f32 %v968_v5, %v964_v4 }
 0x8d6   :  { %1684 = vtanh.f32 %v970_v6  ;;  %984 = vrot.lane.b32.xlu1 %v970_v6, %s1826_s4 }
 0x8dc   :  { %v1685_v13 = vpop.eup %1684 }
 0x8dd   :  { %v972_v58 = vmul.f32 %v1685_v13, %v957_v15 }
 0x8df   :  { %976 = vrot.lane.b32.xlu0 %v972_v58, %s1826_s4 }
 0x948   :  { %v985_v43 = vpop.permute.xlu1 %984 }
 0x949   :  { %v987_v50 = vmul.f32 %v985_v43, %v974_v36  ;;  %v1107_v43 = vsub.f32 1.0, %v1101_v37 }
 0x94b   :  { %v2230_v51 = vadd.f32 %v988_v45, %v987_v50 }
 0x94d   :  { %1088 = vrot.lane.b32.xlu2 %v2230_v51, %s1826_s4  ;;  %v1115_v50 = vmul.f32 %v1107_v43, %v2230_v51  ;;  %v167_v51 = vadd.f32 %v2027_v44, %v2029_v46 }
 0x951   :  { %v977_v55 = vpop.permute.xlu0 %976 }
 0x952   :  { %v2235_v53 = vmul.f32 %v977_v55, %v974_v36 }
 0x954   :  { %v2238_v21 = vadd.f32 %v981_v19, %v2235_v53  ;;  %991 = vst.msk [vmem:[#allocation3 + $0x28] sm:$0xff] %vm355_vm9, %v2235_v53 }
 0x956   :  { %1563 = vmatmul.msk.f32.vlgmr.msra.gmra.mxu0 %vm103_vm0, %v2238_v21  ;;  %1564 = vmatmul.msk.f32.vlgmr.msra.gmra.mxu1 %vm103_vm0, %v2238_v21 }
 0x95b   :  { %v1246_v24 = vld [vmem:[#allocation3 + $0x28] sm:$0xff] }
 0x95e   :  { %1579 = vmatmul.msk.f32.vlgmr.msrb.gmra.mxu1 %vm355_vm9, %v1241_v17 }
 0x966   :  { %1580 = vmatmul.msk.f32.gmra.mxu1 %vm355_vm9, %v1242_v22  ;;  %v1108_v22 = vmul.f32 %v1107_v43, %v2238_v21 }
 0x96e   :  { %1581 = vmatmul.msk.f32.gmra.mxu1 %vm355_vm9, %v1243_v49 }
 0x976   :  { %1582 = vmatmul.msk.f32.gmra.mxu1 %vm355_vm9, %v1244_v59 }
 0x97e   :  { %1583 = vmatmul.msk.f32.gmra.mxu1 %vm355_vm9, %v1245_v23 }
 0x986   :  { %1584 = vmatmul.msk.f32.gmra.mxu1 %vm355_vm9, %v1246_v24 }
 0x9a7   :  { %v1089_v7 = vpop.permute.xlu2 %1088 }
 0x9d3   :  { %v1023_v26 = vpop.f32.mrf.mxu0  ;;  %v1043_v31 = vpop.f32.mrf.mxu1 }
 0x9d4   :  { %v1046_v27 = vadd.f32 %v1023_v26, %v164_v54  ;;  %v1047_v33 = vadd.f32 %v1043_v31, %v205_v39 }
 0x9d6   :  { %v1565_v28 = vmul.f32 -1.442695, %v1046_v27  ;;  %v1566_v47 = vmul.f32 -1.442695, %v1047_v33 }
 0x9d8   :  { %1686 = vpow2.f32 %v1565_v28 }
 0x9de   :  { %v1687_v29 = vpop.eup %1686 }
 0x9df   :  { %v1054_v30 = vadd.f32 1.0, %v1687_v29  ;;  %v208_v29 = vadd.f32 %v2034_v52, %v2036_v56 }
 0x9e1   :  { %1688 = vrcp.f32 %v1054_v30  ;;  %v1067_v11 = vand.u32 2147483648, %v1054_v30  ;;  %v1065_v41 = vand.u32 2147483647, %v1054_v30  ;;  %vm1061_vm8 = vweird.f32 %v1054_v30 }
 0x9e2   :  { %1690 = vtanh.f32 %v1047_v33 }
 0x9e3   :  { %v1068_v62 = vor.u32 1.1754944e-38, %v1067_v11  ;;  %vm1066_vm11 = vcmp.eq.f32.partialorder %v1065_v41, 8.507059e+37  ;;  %1692 = vpow2.f32 %v1566_v47 }
 0x9e7   :  { %v1689_v32 = vpop.eup %1688 }
 0x9e8   :  { %v1057_v38 = vmul.f32 %v1689_v32, %v1054_v30  ;;  %vm1062_vm7 = vweird.f32 %v1689_v32  ;;  %v1691_v0 = vpop.eup %1690 }
 0x9e9   :  { %vm1063_vm10 = vmor %vm1061_vm8, %vm1062_vm7  ;;  %v1693_v2 = vpop.eup %1692  ;;  %vm1407_vm8 = vcmask 80896  }
 0x9ea   :  { %v1058_v35 = vsub.f32 1.0, %v1057_v38  ;;  %v1055_v3 = vadd.f32 1.0, %v1693_v2 }
 0x9ec   :  { %v1059_v14 = vmul.f32 %v1689_v32, %v1058_v35  ;;  %1694 = vrcp.f32 %v1055_v3  ;;  %v1082_v15 = vand.u32 2147483648, %v1055_v3  ;;  %vm1076_vm13 = vweird.f32 %v1055_v3 }
 0x9ed   :  { %v1080_v58 = vand.u32 2147483647, %v1055_v3 }
 0x9ee   :  { %v1060_v42 = vadd.f32 %v1689_v32, %v1059_v14  ;;  %v1083_v20 = vor.u32 1.1754944e-38, %v1082_v15 }
 0x9ef   :  { %vm1081_vm15 = vcmp.eq.f32.partialorder %v1080_v58, 8.507059e+37  ;;  %v1228_v58 = vld [vmem:[#allocation5 + $0x38] sm:$0xff] }
 0x9f0   :  { %v1064_v63 = vsel %vm1063_vm10, %v1689_v32, %v1060_v42 }
 0x9f1   :  { %v1069_v40 = vsel %vm1066_vm11, %v1068_v62, %v1064_v63 }
 0x9f2   :  { %v1092_v1 = vmul.f32 %v1691_v0, %v1069_v40  ;;  %v1695_v4 = vpop.eup %1694  ;;  %v1091_v9 = vmul.f32 %v1089_v7, %v1069_v40 }
 0x9f3   :  { %v1072_v5 = vmul.f32 %v1695_v4, %v1055_v3  ;;  %vm1077_vm12 = vweird.f32 %v1695_v4 }
 0x9f4   :  { %1094 = vrot.lane.b32.xlu0 %v1092_v1, %s1826_s4  ;;  %vm1078_vm14 = vmor %vm1076_vm13, %vm1077_vm12 }
 0x9f5   :  { %v1073_v6 = vsub.f32 1.0, %v1072_v5 }
 0x9f7   :  { %v1074_v8 = vmul.f32 %v1695_v4, %v1073_v6 }
 0x9f9   :  { %v1075_v13 = vadd.f32 %v1695_v4, %v1074_v8 }
 0x9fb   :  { %v1079_v16 = vsel %vm1078_vm14, %v1695_v4, %v1075_v13 }
 0x9fc   :  { %v1084_v34 = vsel %vm1081_vm15, %v1083_v20, %v1079_v16 }
 0xa66   :  { %v1095_v61 = vpop.permute.xlu0 %1094 }
 0xa67   :  { %v1097_v12 = vadd.f32 %v1095_v61, %v1091_v9 }
 0xa69   :  { %1696 = vtanh.f32 %v1097_v12  ;;  %1111 = vrot.lane.b32.xlu2 %v1097_v12, %s1826_s4 }
 0xa6f   :  { %v1697_v25 = vpop.eup %1696 }
 0xa70   :  { %v1099_v36 = vmul.f32 %v1697_v25, %v1084_v34 }
 0xa72   :  { %1103 = vrot.lane.b32.xlu1 %v1099_v36, %s1826_s4  ;;  %v1263_v36 = vld [vmem:[%s2388_s5 + $0x30] sm:$0xff] }
 0xac3   :  { %v1112_v45 = vpop.permute.xlu2 %1111 }
 0xac4   :  { %v1114_v55 = vmul.f32 %v1112_v45, %v1101_v37 }
 0xac6   :  { %v1116_v19 = vadd.f32 %v1115_v50, %v1114_v55 }
 0xac8   :  { %1215 = vrot.lane.b32.xlu0 %v1116_v19, %s1826_s4 }
 0xae4   :  { %v1104_v17 = vpop.permute.xlu1 %1103 }
 0xae5   :  { %v1106_v49 = vmul.f32 %v1104_v17, %v1101_v37  ;;  %v1261_v37 = vld [vmem:[%s2388_s5 + $0x20] sm:$0xff] }
 0xae7   :  { %v1109_v59 = vadd.f32 %v1108_v22, %v1106_v49  ;;  %1118 = vst.msk [vmem:[#allocation3 + $0x30] sm:$0xff] %vm355_vm9, %v1106_v49 }
 0xae9   :  { %1567 = vmatmul.msk.f32.vlgmr.msra.gmra.mxu2 %vm103_vm0, %v1109_v59  ;;  %1568 = vmatmul.msk.f32.vlgmr.msra.gmra.mxu3 %vm103_vm0, %v1109_v59 }
 0xaee   :  { %v1247_v23 = vld [vmem:[#allocation3 + $0x30] sm:$0xff] }
 0xaef   :  { %1585 = vmatmul.msk.f32.gmra.mxu1 %vm355_vm9, %v1247_v23 }
 0xb3a   :  { %v1216_v1 = vpop.permute.xlu0 %1215 }
 0xb6c   :  { %v1150_v24 = vpop.f32.mrf.mxu2  ;;  %v1170_v28 = vpop.f32.mrf.mxu3 }
 0xb6d   :  { %v1173_v54 = vadd.f32 %v1150_v24, %v167_v51  ;;  %v1174_v31 = vadd.f32 %v1170_v28, %v208_v29  ;;  %v1371_v51 = vpop.f32.mrf.mxu1  ;;  %v1613_v24 = vld [vmem:[%s2389_s6] ss:$0 sm:$0xff] }
 0xb6f   :  { %v1569_v26 = vmul.f32 -1.442695, %v1173_v54  ;;  %v1570_v52 = vmul.f32 -1.442695, %v1174_v31 }
 0xb71   :  { %1698 = vpow2.f32 %v1569_v26 }
 0xb75   :  { %v1374_v54 = vpop.f32.mrf.mxu1 }
 0xb77   :  { %v1699_v27 = vpop.eup %1698 }
 0xb78   :  { %v1181_v21 = vadd.f32 1.0, %v1699_v27 }
 0xb7a   :  { %1700 = vrcp.f32 %v1181_v21  ;;  %v1194_v33 = vand.u32 2147483648, %v1181_v21  ;;  %v1192_v44 = vand.u32 2147483647, %v1181_v21  ;;  %vm1188_vm1 = vweird.f32 %v1181_v21 }
 0xb7b   :  { %1702 = vtanh.f32 %v1174_v31 }
 0xb7c   :  { %v1195_v35 = vor.u32 1.1754944e-38, %v1194_v33  ;;  %vm1193_vm3 = vcmp.eq.f32.partialorder %v1192_v44, 8.507059e+37  ;;  %1704 = vpow2.f32 %v1570_v52 }
 0xb7d   :  { %v1377_v31 = vpop.f32.mrf.mxu1 }
 0xb80   :  { %v1701_v30 = vpop.eup %1700 }
 0xb81   :  { %v1184_v39 = vmul.f32 %v1701_v30, %v1181_v21  ;;  %vm1189_vm0 = vweird.f32 %v1701_v30  ;;  %v1703_v14 = vpop.eup %1702 }
 0xb82   :  { %vm1190_vm2 = vmor %vm1188_vm1, %vm1189_vm0  ;;  %v1705_v56 = vpop.eup %1704 }
 0xb83   :  { %v1185_v32 = vsub.f32 1.0, %v1184_v39  ;;  %v1182_v62 = vadd.f32 1.0, %v1705_v56 }
 0xb85   :  { %v1186_v38 = vmul.f32 %v1701_v30, %v1185_v32  ;;  %1706 = vrcp.f32 %v1182_v62  ;;  %vm1203_vm5 = vweird.f32 %v1182_v62  ;;  %v1207_v6 = vand.u32 2147483647, %v1182_v62 }
 0xb87   :  { %v1187_v46 = vadd.f32 %v1701_v30, %v1186_v38  ;;  %vm1208_vm7 = vcmp.eq.f32.partialorder %v1207_v6, 8.507059e+37 }
 0xb89   :  { %v1191_v11 = vsel %vm1190_vm2, %v1701_v30, %v1187_v46  ;;  %v1380_v46 = vpop.f32.mrf.mxu1 }
 0xb8a   :  { %v1196_v41 = vsel %vm1193_vm3, %v1195_v35, %v1191_v11 }
 0xb8b   :  { %v1219_v42 = vmul.f32 %v1703_v14, %v1196_v41  ;;  %v1707_v63 = vpop.eup %1706  ;;  %v1218_v2 = vmul.f32 %v1216_v1, %v1196_v41 }
 0xb8c   :  { %v1199_v0 = vmul.f32 %v1707_v63, %v1182_v62  ;;  %vm1204_vm4 = vweird.f32 %v1707_v63 }
 0xb8d   :  { %1221 = vrot.lane.b32.xlu1 %v1219_v42, %s1826_s4  ;;  %vm1205_vm6 = vmor %vm1203_vm5, %vm1204_vm4 }
 0xb8e   :  { %v1200_v40 = vsub.f32 1.0, %v1199_v0 }
 0xb90   :  { %v1201_v47 = vmul.f32 %v1707_v63, %v1200_v40 }
 0xb91   :  { %v1383_v52 = vpop.f32.mrf.mxu1 }
 0xb92   :  { %v1202_v5 = vadd.f32 %v1707_v63, %v1201_v47 }
 0xb95   :  { %1120 = vrot.lane.b32.xlu1 %v1106_v49, %s1827_s18 }
 0xb99   :  { %v1386_v40 = vpop.f32.mrf.mxu1 }
 0xb9d   :  { %739 = vrot.lane.b32.xlu1 %v2175_v18, %s1827_s18  ;;  %v1209_v18 = vand.u32 2147483648, %v1182_v62 }
 0xb9f   :  { %v1210_v7 = vor.u32 1.1754944e-38, %v1209_v18 }
 0xba5   :  { %358 = vrot.lane.b32.xlu1 %v2051_v60, %s1827_s18  ;;  %v1206_v60 = vsel %vm1205_vm6, %v1707_v63, %v1202_v5 }
 0xba6   :  { %v1211_v61 = vsel %vm1208_vm7, %v1210_v7, %v1206_v60 }
 0xbff   :  { %v1222_v3 = vpop.permute.xlu1 %1221 }
 0xc00   :  { %v1224_v4 = vadd.f32 %v1222_v3, %v1218_v2 }
 0xc02   :  { %1708 = vtanh.f32 %v1224_v4  ;;  %v1389_v4 = vpop.f32.mrf.mxu1 }
 0xc07   :  { %v1121_v8 = vpop.permute.xlu1 %1120 }
 0xc08   :  { %v1709_v9 = vpop.eup %1708  ;;  %1124 = vst.msk [vmem:[#allocation4 + $0x8] sm:$0xff] %vm355_vm9, %v1121_v8 }
 0xc09   :  { %v1226_v12 = vmul.f32 %v1709_v9, %v1211_v61 }
 0xc0b   :  { %1230 = vrot.lane.b32.xlu2 %v1226_v12, %s1826_s4 }
 0xc0f   :  { %v740_v13 = vpop.permute.xlu1 %739  ;;  %v1254_v55 = vld [vmem:[#allocation4 + $0x8] sm:$0xff] }
 0xc10   :  { %743 = vst.msk [vmem:[#allocation4 + $0x20] sm:$0xff] %vm355_vm9, %v740_v13 }
 0xc13   :  { %993 = vrot.lane.b32.xlu2 %v2235_v53, %s1827_s18 }
 0xc17   :  { %v359_v15 = vpop.permute.xlu1 %358  ;;  %v1257_v22 = vld [vmem:[#allocation4 + $0x20] sm:$0xff] }
 0xc18   :  { %362 = vst.msk [vmem:[#allocation4 + $0x38] sm:$0xff] %vm355_vm9, %v359_v15 }
 0xc1b   :  { %612 = vrot.lane.b32.xlu2 %v2137_v57, %s1827_s18  ;;  %v1264_v57 = vld [vmem:[%s2388_s5 + $0x38] sm:$0xff] }
 0xc1c   :  { %1301 = vmatpush.msrb.mxu0 %v1264_v57 }
 0xc1e   :  { %1302 = vmatpush.msrb.mxu0 %v1263_v36 }
 0xc1f   :  { %v1260_v23 = vld [vmem:[#allocation4 + $0x38] sm:$0xff] }
 0xc65   :  { %v1231_v16 = vpop.permute.xlu2 %1230 }
 0xc66   :  { %v1233_v20 = vmul.f32 %v1231_v16, %v1228_v58 }
 0xc68   :  { %1235 = vst.msk [vmem:[#allocation3 + $0x38] sm:$0xff] %vm355_vm9, %v1233_v20  ;;  %1237 = vrot.lane.b32.xlu0 %v1233_v20, %s1827_s18 }
 0xc6d   :  { %v994_v25 = vpop.permute.xlu2 %993 }
 0xc6e   :  { %997 = vst.msk [vmem:[#allocation4 + $0x10] sm:$0xff] %vm355_vm9, %v994_v25 }
 0xc6f   :  { %v1248_v34 = vld [vmem:[#allocation3 + $0x38] sm:$0xff] }
 0xc70   :  { %866 = vrot.lane.b32.xlu0 %v2194_v48, %s1827_s18  ;;  %1586 = vmatmul.msk.f32.gmra.mxu1 %vm355_vm9, %v1248_v34  ;;  %v1262_v48 = vld [vmem:[%s2388_s5 + $0x28] sm:$0xff] }
 0xc71   :  { %1303 = vmatpush.msrb.mxu0 %v1262_v48 }
 0xc73   :  { %1304 = vmatpush.msrb.mxu0 %v1261_v37 }
 0xc75   :  { %v613_v53 = vpop.permute.xlu2 %612  ;;  %v1255_v19 = vld [vmem:[#allocation4 + $0x10] sm:$0xff] }
 0xc76   :  { %616 = vst.msk [vmem:[#allocation4 + $0x28] sm:$0xff] %vm355_vm9, %v613_v53 }
 0xc78   :  { %485 = vrot.lane.b32.xlu0 %v2089_v10, %s1827_s18 }
 0xc7d   :  { %v1258_v49 = vld [vmem:[#allocation4 + $0x28] sm:$0xff] }
 0xcda   :  { %v1238_v10 = vpop.permute.xlu0 %1237 }
 0xcdb   :  { %1240 = vst.msk [vmem:[#allocation4] sm:$0xff] %vm355_vm9, %v1238_v10 }
 0xce2   :  { %v867_v43 = vpop.permute.xlu0 %866  ;;  %v1253_v45 = vld [vmem:[#allocation4] sm:$0xff] }
 0xce3   :  { %870 = vst.msk [vmem:[#allocation4 + $0x18] sm:$0xff] %vm355_vm9, %v867_v43  ;;  %1571 = vmatmul.msk.f32.vlgmr.msrb.gmra.mxu0 %vm355_vm9, %v1253_v45 }
 0xcea   :  { %v486_v50 = vpop.permute.xlu0 %485  ;;  %v1256_v17 = vld [vmem:[#allocation4 + $0x18] sm:$0xff] }
 0xceb   :  { %489 = vst.msk [vmem:[#allocation4 + $0x30] sm:$0xff] %vm355_vm9, %v486_v50  ;;  %1572 = vmatmul.msk.f32.gmra.mxu0 %vm355_vm9, %v1254_v55 }
 0xced   :  { %v1392_v7 = vpop.f32.mrf.mxu1 }
 0xcf2   :  { %v1259_v59 = vld [vmem:[#allocation4 + $0x30] sm:$0xff] }
 0xcf3   :  { %1573 = vmatmul.msk.f32.gmra.mxu0 %vm355_vm9, %v1255_v19 }
 0xcfb   :  { %1574 = vmatmul.msk.f32.gmra.mxu0 %vm355_vm9, %v1256_v17 }
 0xd03   :  { %1575 = vmatmul.msk.f32.gmra.mxu0 %vm355_vm9, %v1257_v22 }
 0xd0b   :  { %1576 = vmatmul.msk.f32.gmra.mxu0 %vm355_vm9, %v1258_v49 }
 0xd13   :  { %1577 = vmatmul.msk.f32.gmra.mxu0 %vm355_vm9, %v1259_v59 }
 0xd1b   :  { %1578 = vmatmul.msk.f32.gmra.mxu0 %vm355_vm9, %v1260_v23 }
 0xd60   :  { %v1306_v26 = vpop.f32.mrf.mxu0 }
 0xd61   :  { %v1372_v27 = vadd.f32 %v1371_v51, %v1306_v26 }
 0xd63   :  { %v1399_v21 = vadd.f32 %v1613_v24, %v1372_v27 }
 0xd65   :  { %v1408_v28 = vsel %vm1407_vm8, %v1399_v21, -inf }
 0xd66   :  { %1409 = vmax.xlane.f32.xlu2 %v1408_v28 }
 0xd68   :  { %v1309_v29 = vpop.f32.mrf.mxu0 }
 0xd69   :  { %v1375_v30 = vadd.f32 %v1374_v54, %v1309_v29 }
 0xd6b   :  { %v1400_v39 = vadd.f32 %v1613_v24, %v1375_v30 }
 0xd6d   :  { %v1411_v32 = vsel %vm1407_vm8, %v1400_v39, -inf }
 0xd6e   :  { %1412 = vmax.xlane.f32.xlu0 %v1411_v32 }
 0xd70   :  { %v1312_v33 = vpop.f32.mrf.mxu0 }
 0xd71   :  { %v1378_v38 = vadd.f32 %v1377_v31, %v1312_v33 }
 0xd73   :  { %v1401_v44 = vadd.f32 %v1613_v24, %v1378_v38 }
 0xd75   :  { %v1414_v35 = vsel %vm1407_vm8, %v1401_v44, -inf }
 0xd76   :  { %1415 = vmax.xlane.f32.xlu1 %v1414_v35 }
 0xd78   :  { %v1315_v11 = vpop.f32.mrf.mxu0 }
 0xd79   :  { %v1381_v14 = vadd.f32 %v1380_v46, %v1315_v11 }
 0xd7b   :  { %v1402_v41 = vadd.f32 %v1613_v24, %v1381_v14 }
 0xd7d   :  { %v1417_v42 = vsel %vm1407_vm8, %v1402_v41, -inf }
 0xd7e   :  { %1418 = vmax.xlane.f32.xlu2 %v1417_v42 }
 0xd80   :  { %v1318_v56 = vpop.f32.mrf.mxu0 }
 0xd81   :  { %v1384_v62 = vadd.f32 %v1383_v52, %v1318_v56 }
 0xd83   :  { %v1403_v63 = vadd.f32 %v1613_v24, %v1384_v62 }
 0xd85   :  { %v1420_v0 = vsel %vm1407_vm8, %v1403_v63, -inf }
 0xd86   :  { %1421 = vmax.xlane.f32.xlu2 %v1420_v0 }
 0xd88   :  { %v1321_v1 = vpop.f32.mrf.mxu0 }
 0xd89   :  { %v1387_v47 = vadd.f32 %v1386_v40, %v1321_v1 }
 0xd8b   :  { %v1404_v2 = vadd.f32 %v1613_v24, %v1387_v47 }
 0xd8d   :  { %v1423_v3 = vsel %vm1407_vm8, %v1404_v2, -inf }
 0xd8e   :  { %1424 = vmax.xlane.f32.xlu0 %v1423_v3 }
 0xd90   :  { %v1324_v5 = vpop.f32.mrf.mxu0 }
 0xd91   :  { %v1390_v18 = vadd.f32 %v1389_v4, %v1324_v5 }
 0xd93   :  { %v1405_v6 = vadd.f32 %v1613_v24, %v1390_v18 }
 0xd95   :  { %v1426_v60 = vsel %vm1407_vm8, %v1405_v6, -inf }
 0xd96   :  { %1427 = vmax.xlane.f32.xlu1 %v1426_v60 }
 0xd98   :  { %v1327_v8 = vpop.f32.mrf.mxu0 }
 0xd99   :  { %v1393_v9 = vadd.f32 %v1392_v7, %v1327_v8 }
 0xd9b   :  { %v1406_v61 = vadd.f32 %v1613_v24, %v1393_v9 }
 0xd9d   :  { %v1429_v12 = vsel %vm1407_vm8, %v1406_v61, -inf }
 0xd9e   :  { %1430 = vmax.xlane.f32.xlu2 %v1429_v12 }
 0xdd9   :  { %v1410_v13 = vpop.xlane.xlu2 %1409 }
 0xdda   :  { %v2327_v15 = vsub.f32 %v1399_v21, %v1410_v13 }
 0xddc   :  { %v1440_v58 = vmul.f32 1.442695, %v2327_v15 }
 0xdde   :  { %1710 = vpow2.f32 %v1440_v58 }
 0xde1   :  { %v1413_v16 = vpop.xlane.xlu0 %1412 }
 0xde2   :  { %v2330_v20 = vsub.f32 %v1400_v39, %v1413_v16 }
 0xde4   :  { %v1711_v25 = vpop.eup %1710  ;;  %v1442_v34 = vmul.f32 1.442695, %v2330_v20 }
 0xde5   :  { %v1456_v53 = vsel %vm1407_vm8, %v1711_v25, 0.0 }
 0xde6   :  { %1712 = vpow2.f32 %v1442_v34  ;;  %1457 = vadd.xlane.f32.xlu0 %v1456_v53 }
 0xde9   :  { %v1416_v57 = vpop.xlane.xlu1 %1415 }
 0xdea   :  { %v2334_v36 = vsub.f32 %v1401_v44, %v1416_v57 }
 0xdec   :  { %v1713_v48 = vpop.eup %1712  ;;  %v1444_v37 = vmul.f32 1.442695, %v2334_v36 }
 0xded   :  { %v1459_v10 = vsel %vm1407_vm8, %v1713_v48, 0.0 }
 0xdee   :  { %1714 = vpow2.f32 %v1444_v37  ;;  %1460 = vadd.xlane.f32.xlu1 %v1459_v10 }
 0xdf1   :  { %v1419_v43 = vpop.xlane.xlu2 %1418 }
 0xdf2   :  { %v2338_v45 = vsub.f32 %v1402_v41, %v1419_v43 }
 0xdf4   :  { %v1715_v50 = vpop.eup %1714  ;;  %v1446_v55 = vmul.f32 1.442695, %v2338_v45 }
 0xdf5   :  { %v1462_v19 = vsel %vm1407_vm8, %v1715_v50, 0.0 }
 0xdf6   :  { %1716 = vpow2.f32 %v1446_v55  ;;  %1463 = vadd.xlane.f32.xlu2 %v1462_v19 }
 0xdf9   :  { %v1422_v17 = vpop.xlane.xlu2 %1421 }
 0xdfa   :  { %v1436_v22 = vsub.f32 %v1403_v63, %v1422_v17 }
 0xdfc   :  { %v1717_v49 = vpop.eup %1716  ;;  %v1448_v59 = vmul.f32 1.442695, %v1436_v22 }
 0xdfd   :  { %v1465_v23 = vsel %vm1407_vm8, %v1717_v49, 0.0 }
 0xdfe   :  { %1718 = vpow2.f32 %v1448_v59  ;;  %1466 = vadd.xlane.f32.xlu0 %v1465_v23 }
 0xe01   :  { %v1425_v51 = vpop.xlane.xlu0 %1424 }
 0xe02   :  { %v1437_v24 = vsub.f32 %v1404_v2, %v1425_v51 }
 0xe04   :  { %v1719_v54 = vpop.eup %1718  ;;  %v1450_v26 = vmul.f32 1.442695, %v1437_v24 }
 0xe05   :  { %v1468_v27 = vsel %vm1407_vm8, %v1719_v54, 0.0 }
 0xe06   :  { %1720 = vpow2.f32 %v1450_v26  ;;  %1469 = vadd.xlane.f32.xlu1 %v1468_v27 }
 0xe09   :  { %v1428_v21 = vpop.xlane.xlu1 %1427 }
 0xe0a   :  { %v1438_v28 = vsub.f32 %v1405_v6, %v1428_v21 }
 0xe0c   :  { %v1721_v29 = vpop.eup %1720  ;;  %v1452_v30 = vmul.f32 1.442695, %v1438_v28 }
 0xe0d   :  { %v1471_v31 = vsel %vm1407_vm8, %v1721_v29, 0.0 }
 0xe0e   :  { %1722 = vpow2.f32 %v1452_v30  ;;  %1472 = vadd.xlane.f32.xlu2 %v1471_v31 }
 0xe11   :  { %v1431_v39 = vpop.xlane.xlu2 %1430 }
 0xe12   :  { %v1439_v32 = vsub.f32 %v1406_v61, %v1431_v39 }
 0xe14   :  { %v1723_v33 = vpop.eup %1722  ;;  %v1454_v38 = vmul.f32 1.442695, %v1439_v32 }
 0xe15   :  { %v1474_v44 = vsel %vm1407_vm8, %v1723_v33, 0.0 }
 0xe16   :  { %1724 = vpow2.f32 %v1454_v38  ;;  %1475 = vadd.xlane.f32.xlu0 %v1474_v44 }
 0xe1c   :  { %v1725_v46 = vpop.eup %1724 }
 0xe1d   :  { %v1477_v35 = vsel %vm1407_vm8, %v1725_v46, 0.0 }
 0xe1e   :  { %1478 = vadd.xlane.f32.xlu1 %v1477_v35 }
 0xe59   :  { %v1458_v11 = vpop.xlane.xlu0 %1457 }
 0xe5a   :  { %1726 = vlog2.f32 %v1458_v11 }
 0xe60   :  { %v1727_v14 = vpop.eup %1726 }
 0xe61   :  { %v1481_v41 = vmul.f32 0.6931472, %v1727_v14  ;;  %v1461_v42 = vpop.xlane.xlu1 %1460 }
 0xe62   :  { %1728 = vlog2.f32 %v1461_v42 }
 0xe63   :  { %v1496_v52 = vsub.f32 %v2327_v15, %v1481_v41 }
 0xe65   :  { %1504 = vst.msk [vmem:[%s2390_s7] sm:$0xff] %vm1407_vm8, %v1496_v52 }
 0xe68   :  { %v1729_v56 = vpop.eup %1728 }
 0xe69   :  { %v1483_v62 = vmul.f32 0.6931472, %v1729_v56  ;;  %v1464_v63 = vpop.xlane.xlu2 %1463 }
 0xe6a   :  { %1730 = vlog2.f32 %v1464_v63 }
 0xe6b   :  { %v1497_v0 = vsub.f32 %v2330_v20, %v1483_v62 }
 0xe6d   :  { %1505 = vst.msk [vmem:[%s2390_s7 + $0x8] sm:$0xff] %vm1407_vm8, %v1497_v0 }
 0xe70   :  { %v1731_v40 = vpop.eup %1730 }
 0xe71   :  { %v1485_v1 = vmul.f32 0.6931472, %v1731_v40  ;;  %v1467_v47 = vpop.xlane.xlu0 %1466 }
 0xe72   :  { %1732 = vlog2.f32 %v1467_v47 }
 0xe73   :  { %v1498_v2 = vsub.f32 %v2334_v36, %v1485_v1 }
 0xe75   :  { %1506 = vst.msk [vmem:[%s2390_s7 + $0x10] sm:$0xff] %vm1407_vm8, %v1498_v2 }
 0xe78   :  { %v1733_v3 = vpop.eup %1732 }
 0xe79   :  { %v1487_v4 = vmul.f32 0.6931472, %v1733_v3  ;;  %v1470_v5 = vpop.xlane.xlu1 %1469 }
 0xe7a   :  { %1734 = vlog2.f32 %v1470_v5 }
 0xe7b   :  { %v1499_v18 = vsub.f32 %v2338_v45, %v1487_v4 }
 0xe7d   :  { %1507 = vst.msk [vmem:[%s2390_s7 + $0x18] sm:$0xff] %vm1407_vm8, %v1499_v18 }
 0xe80   :  { %v1735_v6 = vpop.eup %1734 }
 0xe81   :  { %v1489_v60 = vmul.f32 0.6931472, %v1735_v6  ;;  %v1473_v7 = vpop.xlane.xlu2 %1472 }
 0xe82   :  { %1736 = vlog2.f32 %v1473_v7 }
 0xe83   :  { %v1500_v8 = vsub.f32 %v1436_v22, %v1489_v60 }
 0xe85   :  { %1508 = vst.msk [vmem:[%s2390_s7 + $0x20] sm:$0xff] %vm1407_vm8, %v1500_v8 }
 0xe88   :  { %v1737_v9 = vpop.eup %1736 }
 0xe89   :  { %v1491_v61 = vmul.f32 0.6931472, %v1737_v9  ;;  %v1476_v12 = vpop.xlane.xlu0 %1475 }
 0xe8a   :  { %1738 = vlog2.f32 %v1476_v12 }
 0xe8b   :  { %v1501_v13 = vsub.f32 %v1437_v24, %v1491_v61 }
 0xe8d   :  { %1509 = vst.msk [vmem:[%s2390_s7 + $0x28] sm:$0xff] %vm1407_vm8, %v1501_v13 }
 0xe90   :  { %v1739_v15 = vpop.eup %1738 }
 0xe91   :  { %v1493_v58 = vmul.f32 0.6931472, %v1739_v15  ;;  %v1479_v16 = vpop.xlane.xlu1 %1478 }
 0xe92   :  { %1740 = vlog2.f32 %v1479_v16 }
 0xe93   :  { %v1502_v20 = vsub.f32 %v1438_v28, %v1493_v58 }
 0xe95   :  { %1510 = vst.msk [vmem:[%s2390_s7 + $0x30] sm:$0xff] %vm1407_vm8, %v1502_v20 }
 0xe98   :  { %v1741_v25 = vpop.eup %1740 }
 0xe99   :  { %v1495_v34 = vmul.f32 0.6931472, %v1741_v25 }
 0xe9b   :  { %v1503_v53 = vsub.f32 %v1439_v32, %v1495_v34 }
 0xe9d   :  { %1511 = vst.msk [vmem:[%s2390_s7 + $0x38] sm:$0xff] %vm1407_vm8, %v1503_v53 }
 0xe9e   :  { %1516 = vsyncpa [#allocation6], 1 }
 0xe9f   :  { %1517 = vsyncpa [#allocation8], 1 }

</bundles_post_ra>
